<compile_context>
chip_gen: v7x
topology: tpu7x:2x2x1
jax: 0.10.0
libtpu: 0.0.40
codegen_flags: <defaults>
</compile_context>

<pallas_src>
import jax
import jax.numpy as jnp
from jax.experimental import pallas as pl
from jax.experimental.pallas import tpu as pltpu

BIN_COUNT = 10  # histogram bins 0..10, same as the PyTorch module


# ----------------------------- Pallas kernels ------------------------------ #
def _stats_kernel(x_ref, score_ref):
    """Row-wise score for a (TR, H*W) block; one row = one (b, c) plane."""
    x = x_ref[...].astype(jnp.float32)                 # (TR, HW)
    n = x.shape[1]

    # Unbiased variance (torch.var default, ddof=1), two-pass for stability so
    # score ordering (and therefore channel selection) matches the reference.
    mean = jnp.mean(x, axis=1, keepdims=True)
    d = x - mean
    var = jnp.sum(d * d, axis=1, keepdims=True) * (1.0 / float(n - 1))

    q = jnp.round(jnp.tanh(x) * float(BIN_COUNT))      # integer values in [-10, 10]
    total = jnp.zeros_like(var)
    clogc = jnp.zeros_like(var)
    # Histogram over bins 0..10.  Accumulate sum(c) and sum(c*log c) incrementally
    # so only two (TR, 1) temporaries stay live instead of 11 count tensors.  The
    # static Python loop unrolls to straight-line code (full LLO visibility).
    # TODO(synk): the 11 cross-lane reductions could be folded into one MXU dot
    # against a ones vector if the stats pass ever becomes XLU-bound.
    for k in range(BIN_COUNT + 1):
        cnt = jnp.sum(jnp.where(q == float(k), 1.0, 0.0), axis=1, keepdims=True)
        total = total + cnt
        clogc = clogc + jnp.where(cnt > 0.0, cnt * jnp.log(cnt), 0.0)
    # entropy = log(T) - sum(c*log c)/T  (== -sum p*log p with 0*log0 := 0);
    # T == 0 (no element in bins 0..10) falls back to entropy 0.
    safe_t = jnp.maximum(total, 1.0)
    entropy = jnp.where(total > 0.0, jnp.log(safe_t) - clogc / safe_t, 0.0)

    score_ref[...] = entropy + 2.0 / (var + 1e-7)


def _conv_kernel(sel_ref, x_ref, o_ref):
    """3x3 Laplacian (zero padding) on one selected (H, W) plane.

    Channel selection happens entirely in the data-dependent index_map (sel_ref);
    every block this kernel sees gets the Laplacian.  Stencil = roll-based
    shift-adds (VPU/XLU), accumulation in f32, store in the input dtype.
    """
    del sel_ref                                        # only used by the index_map
    x = x_ref[0].astype(jnp.float32)                   # (H, W)
    h, w = x.shape
    row = jax.lax.broadcasted_iota(jnp.int32, (h, w), 0)
    col = jax.lax.broadcasted_iota(jnp.int32, (h, w), 1)
    # 3-tap horizontal sum (lane axis) with zero fill at the borders.
    xr = jnp.where(col > 0, pltpu.roll(x, shift=1, axis=1), 0.0)           # x[:, j-1]
    xl = jnp.where(col < w - 1, pltpu.roll(x, shift=w - 1, axis=1), 0.0)   # x[:, j+1]
    sh = x + xl + xr
    # 3-tap vertical sum (sublane axis) with zero fill at the borders.
    sd = jnp.where(row > 0, pltpu.roll(sh, shift=1, axis=0), 0.0)          # sh[i-1, :]
    su = jnp.where(row < h - 1, pltpu.roll(sh, shift=h - 1, axis=0), 0.0)  # sh[i+1, :]
    box = sh + su + sd                                 # 3x3 box sum, zero padded
    o_ref[0] = (9.0 * x - box).astype(o_ref.dtype)     # Laplace = 8*x - neighbors


# ------------------------------ host wrapper ------------------------------- #
def _pick_row_tile(rows, row_bytes, target_bytes=2 << 20):
    """Largest row-block (multiple of 8) with <= ~target_bytes per input buffer.

    ~2 MiB per buffer (double-buffered -> ~4 MiB) stays far under the 32 MiB
    VMEM cap while amortizing the ~0.35 us per-grid-step overhead.
    """
    if rows <= 8:
        return rows
    tr = max(8, (target_bytes // max(row_bytes, 1)) // 8 * 8)
    return rows if tr >= rows else tr


def _channel_scores(x):
    """Per-(b, c) heuristic score, tiled & pipelined over the B*C rows."""
    b, c, h, w = x.shape
    rows, hw = b * c, h * w
    x2d = x.reshape(rows, hw)                          # lane-dense: HW on lanes
    tr = _pick_row_tile(rows, hw * x.dtype.itemsize)
    score = pl.pallas_call(
        _stats_kernel,
        out_shape=jax.ShapeDtypeStruct((rows, 1), jnp.float32),
        grid=(pl.cdiv(rows, tr),),
        in_specs=[pl.BlockSpec((tr, hw), lambda i: (i, 0))],
        out_specs=pl.BlockSpec((tr, 1), lambda i: (i, 0)),
        compiler_params=pltpu.CompilerParams(
            dimension_semantics=("parallel",),
            vmem_limit_bytes=32 * 1024 * 1024,   # explicit cap: safe on v5e/v6e/v7x
        ),
    )(x2d)
    return score.reshape(b, c)


def heuristic_dropout_forward(x, rate=0.1, threshold=0.5, training=True):
    del threshold  # unused by the PyTorch forward as well
    if not training:
        return x
    b, c, h, w = x.shape
    k = int(round(rate * c))
    if k == 0:
        return x  # identity filters everywhere -> output == input exactly

    # --- stats kernel: per-(b, c) score ---
    score = _channel_scores(x)                         # (b, c) f32

    # --- glue: per-batch top-k channel indices (like torch.sort descending) ---
    _, top_idx = jax.lax.top_k(score, k)               # (b, k)
    # Flat row indices into the (B*C, H, W) view; 1-D int32 keeps SMEM padding minimal.
    sel = (jnp.arange(b, dtype=jnp.int32)[:, None] * c
           + top_idx.astype(jnp.int32)).reshape(-1)    # (b*k,)

    # --- conv kernel: only the selected channels are read & rewritten in place ---
    x3 = x.reshape(b * c, h, w)
    out3 = pl.pallas_call(
        _conv_kernel,
        out_shape=jax.ShapeDtypeStruct((b * c, h, w), x.dtype),
        grid_spec=pltpu.PrefetchScalarGridSpec(
            num_scalar_prefetch=1,
            grid=(b * k,),
            in_specs=[pl.BlockSpec((1, h, w), lambda g, sel_ref: (sel_ref[g], 0, 0))],
            out_specs=pl.BlockSpec((1, h, w), lambda g, sel_ref: (sel_ref[g], 0, 0)),
        ),
        # Output aliases x3: untouched channels keep their original values, so the
        # kernel's HBM traffic and grid steps scale with rate*C, not C.
        input_output_aliases={1: 0},
        compiler_params=pltpu.CompilerParams(
            dimension_semantics=("parallel",)),
    )(sel, x3)
    # TODO(synk): for very small W (<128 lanes) the per-channel stores are lane-sparse;
    # packing several selected channels along the lane axis would need a masked stencil
    # at channel boundaries and is not implemented here.
    return out3.reshape(b, c, h, w)


# -------------------------- pure-JAX reference ----------------------------- #
def _ref_module(x, rate=0.1):
    b, c, h, w = x.shape
    xf = x.astype(jnp.float32)
    var = jnp.var(xf, axis=(2, 3), ddof=1)
    q = jnp.round(jnp.tanh(xf) * BIN_COUNT).reshape(b, c, -1)
    bins = jnp.arange(0, BIN_COUNT + 1)
    hist = jnp.sum((q[..., None] == bins).astype(jnp.float32), axis=2)
    p = hist / jnp.sum(hist, axis=-1, keepdims=True)
    ent = -jnp.sum(jnp.where(p > 0, p * jnp.log(p), 0.0), axis=-1)
    score = ent + 2.0 / (var + 1e-7)
    k = int(round(rate * c))
    mask = jnp.zeros((b, c), jnp.int32)
    if k > 0:
        order = jnp.argsort(-score, axis=1)
        mask = mask.at[jnp.arange(b)[:, None], order[:, :k]].set(1)
    xp = jnp.pad(xf, ((0, 0), (0, 0), (1, 1), (1, 1)))
    box = jnp.zeros_like(xf)
    for di in range(3):
        for dj in range(3):
            box = box + xp[:, :, di:di + h, dj:dj + w]
    lap = 9.0 * xf - box
    return jnp.where(mask[:, :, None, None] > 0, lap, xf).astype(x.dtype)


if __name__ == "__main__":
    key = jax.random.PRNGKey(0)
    b, c, h, w = 2, 16, 16, 16            # round(0.1 * 16) = 2 channels per batch dropped
    x = jax.random.normal(key, (b, c, h, w), dtype=jnp.float32) * 1.5

    out = heuristic_dropout_forward(x, rate=0.1, training=True)
    out = jax.block_until_ready(out)

    assert out.shape == (b, c, h, w) and out.dtype == x.dtype
    ref = _ref_module(x, rate=0.1)
    assert jnp.allclose(out, ref, rtol=1e-4, atol=1e-4), "mismatch vs pure-JAX reference"

    print("KERNEL_OK")
</pallas_src>

<mosaic_0001>
module attributes {stable_mosaic.version = 11 : i64} {
  func.func @_stats_kernel(%arg0: i32, %arg1: memref<32x256xf32, #tpu.memory_space<vmem>>, %arg2: memref<32x1xf32, #tpu.memory_space<vmem>>) attributes {dimension_semantics = [#tpu.dimension_semantics<parallel>], iteration_bounds = array<i64: 1>, scalar_prefetch = 0 : i64, scratch_operands = 0 : i64, tpu.core_type = #tpu.core_type<tc>, window_params = [{transform_indices = @transform_0, window_bounds = array<i64: 32, 256>}, {transform_indices = @transform_1, window_bounds = array<i64: 32, 1>}]} {
    %c0 = arith.constant 0 : index
    %c0_0 = arith.constant 0 : index
    %0 = vector.load %arg1[%c0, %c0_0] : memref<32x256xf32, #tpu.memory_space<vmem>>, vector<32x256xf32>
    %cst = arith.constant dense<0.000000e+00> : vector<32xf32>
    %1 = vector.multi_reduction <add>, %0, %cst [1] : vector<32x256xf32> to vector<32xf32>
    %2 = vector.shape_cast %1 : vector<32xf32> to vector<32x1xf32>
    %cst_1 = arith.constant 2.560000e+02 : f32
    %3 = vector.broadcast %cst_1 : f32 to vector<32x1xf32>
    %4 = arith.divf %2, %3 : vector<32x1xf32>
    %5 = vector.broadcast %4 : vector<32x1xf32> to vector<32x256xf32>
    %6 = arith.subf %0, %5 : vector<32x256xf32>
    %7 = arith.mulf %6, %6 : vector<32x256xf32>
    %cst_2 = arith.constant dense<0.000000e+00> : vector<32xf32>
    %8 = vector.multi_reduction <add>, %7, %cst_2 [1] : vector<32x256xf32> to vector<32xf32>
    %9 = vector.shape_cast %8 : vector<32xf32> to vector<32x1xf32>
    %cst_3 = arith.constant 0.00392156886 : f32
    %10 = vector.broadcast %cst_3 : f32 to vector<32x1xf32>
    %11 = arith.mulf %9, %10 : vector<32x1xf32>
    %12 = math.tanh %0 : vector<32x256xf32>
    %cst_4 = arith.constant 1.000000e+01 : f32
    %13 = vector.broadcast %cst_4 : f32 to vector<32x256xf32>
    %14 = arith.mulf %12, %13 : vector<32x256xf32>
    %15 = math.roundeven %14 : vector<32x256xf32>
    %cst_5 = arith.constant 0.000000e+00 : f32
    %16 = vector.broadcast %cst_5 : f32 to vector<32x1xf32>
    %cst_6 = arith.constant 0.000000e+00 : f32
    %17 = vector.broadcast %cst_6 : f32 to vector<32x1xf32>
    %cst_7 = arith.constant 0.000000e+00 : f32
    %18 = vector.broadcast %cst_7 : f32 to vector<32x256xf32>
    %19 = arith.cmpf oeq, %15, %18 : vector<32x256xf32>
    %cst_8 = arith.constant 1.000000e+00 : f32
    %cst_9 = arith.constant 0.000000e+00 : f32
    %20 = vector.broadcast %cst_8 : f32 to vector<32x256xf32>
    %21 = vector.broadcast %cst_9 : f32 to vector<32x256xf32>
    %22 = arith.select %19, %20, %21 : vector<32x256xi1>, vector<32x256xf32>
    %cst_10 = arith.constant dense<0.000000e+00> : vector<32xf32>
    %23 = vector.multi_reduction <add>, %22, %cst_10 [1] : vector<32x256xf32> to vector<32xf32>
    %24 = vector.shape_cast %23 : vector<32xf32> to vector<32x1xf32>
    %25 = arith.addf %16, %24 : vector<32x1xf32>
    %cst_11 = arith.constant 0.000000e+00 : f32
    %26 = vector.broadcast %cst_11 : f32 to vector<32x1xf32>
    %27 = arith.cmpf ogt, %24, %26 : vector<32x1xf32>
    %28 = math.log %24 : vector<32x1xf32>
    %29 = arith.mulf %24, %28 : vector<32x1xf32>
    %cst_12 = arith.constant 0.000000e+00 : f32
    %30 = vector.broadcast %cst_12 : f32 to vector<32x1xf32>
    %31 = arith.select %27, %29, %30 : vector<32x1xi1>, vector<32x1xf32>
    %32 = arith.addf %17, %31 : vector<32x1xf32>
    %cst_13 = arith.constant 1.000000e+00 : f32
    %33 = vector.broadcast %cst_13 : f32 to vector<32x256xf32>
    %34 = arith.cmpf oeq, %15, %33 : vector<32x256xf32>
    %cst_14 = arith.constant 1.000000e+00 : f32
    %cst_15 = arith.constant 0.000000e+00 : f32
    %35 = vector.broadcast %cst_14 : f32 to vector<32x256xf32>
    %36 = vector.broadcast %cst_15 : f32 to vector<32x256xf32>
    %37 = arith.select %34, %35, %36 : vector<32x256xi1>, vector<32x256xf32>
    %cst_16 = arith.constant dense<0.000000e+00> : vector<32xf32>
    %38 = vector.multi_reduction <add>, %37, %cst_16 [1] : vector<32x256xf32> to vector<32xf32>
    %39 = vector.shape_cast %38 : vector<32xf32> to vector<32x1xf32>
    %40 = arith.addf %25, %39 : vector<32x1xf32>
    %cst_17 = arith.constant 0.000000e+00 : f32
    %41 = vector.broadcast %cst_17 : f32 to vector<32x1xf32>
    %42 = arith.cmpf ogt, %39, %41 : vector<32x1xf32>
    %43 = math.log %39 : vector<32x1xf32>
    %44 = arith.mulf %39, %43 : vector<32x1xf32>
    %cst_18 = arith.constant 0.000000e+00 : f32
    %45 = vector.broadcast %cst_18 : f32 to vector<32x1xf32>
    %46 = arith.select %42, %44, %45 : vector<32x1xi1>, vector<32x1xf32>
    %47 = arith.addf %32, %46 : vector<32x1xf32>
    %cst_19 = arith.constant 2.000000e+00 : f32
    %48 = vector.broadcast %cst_19 : f32 to vector<32x256xf32>
    %49 = arith.cmpf oeq, %15, %48 : vector<32x256xf32>
    %cst_20 = arith.constant 1.000000e+00 : f32
    %cst_21 = arith.constant 0.000000e+00 : f32
    %50 = vector.broadcast %cst_20 : f32 to vector<32x256xf32>
    %51 = vector.broadcast %cst_21 : f32 to vector<32x256xf32>
    %52 = arith.select %49, %50, %51 : vector<32x256xi1>, vector<32x256xf32>
    %cst_22 = arith.constant dense<0.000000e+00> : vector<32xf32>
    %53 = vector.multi_reduction <add>, %52, %cst_22 [1] : vector<32x256xf32> to vector<32xf32>
    %54 = vector.shape_cast %53 : vector<32xf32> to vector<32x1xf32>
    %55 = arith.addf %40, %54 : vector<32x1xf32>
    %cst_23 = arith.constant 0.000000e+00 : f32
    %56 = vector.broadcast %cst_23 : f32 to vector<32x1xf32>
    %57 = arith.cmpf ogt, %54, %56 : vector<32x1xf32>
    %58 = math.log %54 : vector<32x1xf32>
    %59 = arith.mulf %54, %58 : vector<32x1xf32>
    %cst_24 = arith.constant 0.000000e+00 : f32
    %60 = vector.broadcast %cst_24 : f32 to vector<32x1xf32>
    %61 = arith.select %57, %59, %60 : vector<32x1xi1>, vector<32x1xf32>
    %62 = arith.addf %47, %61 : vector<32x1xf32>
    %cst_25 = arith.constant 3.000000e+00 : f32
    %63 = vector.broadcast %cst_25 : f32 to vector<32x256xf32>
    %64 = arith.cmpf oeq, %15, %63 : vector<32x256xf32>
    %cst_26 = arith.constant 1.000000e+00 : f32
    %cst_27 = arith.constant 0.000000e+00 : f32
    %65 = vector.broadcast %cst_26 : f32 to vector<32x256xf32>
    %66 = vector.broadcast %cst_27 : f32 to vector<32x256xf32>
    %67 = arith.select %64, %65, %66 : vector<32x256xi1>, vector<32x256xf32>
    %cst_28 = arith.constant dense<0.000000e+00> : vector<32xf32>
    %68 = vector.multi_reduction <add>, %67, %cst_28 [1] : vector<32x256xf32> to vector<32xf32>
    %69 = vector.shape_cast %68 : vector<32xf32> to vector<32x1xf32>
    %70 = arith.addf %55, %69 : vector<32x1xf32>
    %cst_29 = arith.constant 0.000000e+00 : f32
    %71 = vector.broadcast %cst_29 : f32 to vector<32x1xf32>
    %72 = arith.cmpf ogt, %69, %71 : vector<32x1xf32>
    %73 = math.log %69 : vector<32x1xf32>
    %74 = arith.mulf %69, %73 : vector<32x1xf32>
    %cst_30 = arith.constant 0.000000e+00 : f32
    %75 = vector.broadcast %cst_30 : f32 to vector<32x1xf32>
    %76 = arith.select %72, %74, %75 : vector<32x1xi1>, vector<32x1xf32>
    %77 = arith.addf %62, %76 : vector<32x1xf32>
    %cst_31 = arith.constant 4.000000e+00 : f32
    %78 = vector.broadcast %cst_31 : f32 to vector<32x256xf32>
    %79 = arith.cmpf oeq, %15, %78 : vector<32x256xf32>
    %cst_32 = arith.constant 1.000000e+00 : f32
    %cst_33 = arith.constant 0.000000e+00 : f32
    %80 = vector.broadcast %cst_32 : f32 to vector<32x256xf32>
    %81 = vector.broadcast %cst_33 : f32 to vector<32x256xf32>
    %82 = arith.select %79, %80, %81 : vector<32x256xi1>, vector<32x256xf32>
    %cst_34 = arith.constant dense<0.000000e+00> : vector<32xf32>
    %83 = vector.multi_reduction <add>, %82, %cst_34 [1] : vector<32x256xf32> to vector<32xf32>
    %84 = vector.shape_cast %83 : vector<32xf32> to vector<32x1xf32>
    %85 = arith.addf %70, %84 : vector<32x1xf32>
    %cst_35 = arith.constant 0.000000e+00 : f32
    %86 = vector.broadcast %cst_35 : f32 to vector<32x1xf32>
    %87 = arith.cmpf ogt, %84, %86 : vector<32x1xf32>
    %88 = math.log %84 : vector<32x1xf32>
    %89 = arith.mulf %84, %88 : vector<32x1xf32>
    %cst_36 = arith.constant 0.000000e+00 : f32
    %90 = vector.broadcast %cst_36 : f32 to vector<32x1xf32>
    %91 = arith.select %87, %89, %90 : vector<32x1xi1>, vector<32x1xf32>
    %92 = arith.addf %77, %91 : vector<32x1xf32>
    %cst_37 = arith.constant 5.000000e+00 : f32
    %93 = vector.broadcast %cst_37 : f32 to vector<32x256xf32>
    %94 = arith.cmpf oeq, %15, %93 : vector<32x256xf32>
    %cst_38 = arith.constant 1.000000e+00 : f32
    %cst_39 = arith.constant 0.000000e+00 : f32
    %95 = vector.broadcast %cst_38 : f32 to vector<32x256xf32>
    %96 = vector.broadcast %cst_39 : f32 to vector<32x256xf32>
    %97 = arith.select %94, %95, %96 : vector<32x256xi1>, vector<32x256xf32>
    %cst_40 = arith.constant dense<0.000000e+00> : vector<32xf32>
    %98 = vector.multi_reduction <add>, %97, %cst_40 [1] : vector<32x256xf32> to vector<32xf32>
    %99 = vector.shape_cast %98 : vector<32xf32> to vector<32x1xf32>
    %100 = arith.addf %85, %99 : vector<32x1xf32>
    %cst_41 = arith.constant 0.000000e+00 : f32
    %101 = vector.broadcast %cst_41 : f32 to vector<32x1xf32>
    %102 = arith.cmpf ogt, %99, %101 : vector<32x1xf32>
    %103 = math.log %99 : vector<32x1xf32>
    %104 = arith.mulf %99, %103 : vector<32x1xf32>
    %cst_42 = arith.constant 0.000000e+00 : f32
    %105 = vector.broadcast %cst_42 : f32 to vector<32x1xf32>
    %106 = arith.select %102, %104, %105 : vector<32x1xi1>, vector<32x1xf32>
    %107 = arith.addf %92, %106 : vector<32x1xf32>
    %cst_43 = arith.constant 6.000000e+00 : f32
    %108 = vector.broadcast %cst_43 : f32 to vector<32x256xf32>
    %109 = arith.cmpf oeq, %15, %108 : vector<32x256xf32>
    %cst_44 = arith.constant 1.000000e+00 : f32
    %cst_45 = arith.constant 0.000000e+00 : f32
    %110 = vector.broadcast %cst_44 : f32 to vector<32x256xf32>
    %111 = vector.broadcast %cst_45 : f32 to vector<32x256xf32>
    %112 = arith.select %109, %110, %111 : vector<32x256xi1>, vector<32x256xf32>
    %cst_46 = arith.constant dense<0.000000e+00> : vector<32xf32>
    %113 = vector.multi_reduction <add>, %112, %cst_46 [1] : vector<32x256xf32> to vector<32xf32>
    %114 = vector.shape_cast %113 : vector<32xf32> to vector<32x1xf32>
    %115 = arith.addf %100, %114 : vector<32x1xf32>
    %cst_47 = arith.constant 0.000000e+00 : f32
    %116 = vector.broadcast %cst_47 : f32 to vector<32x1xf32>
    %117 = arith.cmpf ogt, %114, %116 : vector<32x1xf32>
    %118 = math.log %114 : vector<32x1xf32>
    %119 = arith.mulf %114, %118 : vector<32x1xf32>
    %cst_48 = arith.constant 0.000000e+00 : f32
    %120 = vector.broadcast %cst_48 : f32 to vector<32x1xf32>
    %121 = arith.select %117, %119, %120 : vector<32x1xi1>, vector<32x1xf32>
    %122 = arith.addf %107, %121 : vector<32x1xf32>
    %cst_49 = arith.constant 7.000000e+00 : f32
    %123 = vector.broadcast %cst_49 : f32 to vector<32x256xf32>
    %124 = arith.cmpf oeq, %15, %123 : vector<32x256xf32>
    %cst_50 = arith.constant 1.000000e+00 : f32
    %cst_51 = arith.constant 0.000000e+00 : f32
    %125 = vector.broadcast %cst_50 : f32 to vector<32x256xf32>
    %126 = vector.broadcast %cst_51 : f32 to vector<32x256xf32>
    %127 = arith.select %124, %125, %126 : vector<32x256xi1>, vector<32x256xf32>
    %cst_52 = arith.constant dense<0.000000e+00> : vector<32xf32>
    %128 = vector.multi_reduction <add>, %127, %cst_52 [1] : vector<32x256xf32> to vector<32xf32>
    %129 = vector.shape_cast %128 : vector<32xf32> to vector<32x1xf32>
    %130 = arith.addf %115, %129 : vector<32x1xf32>
    %cst_53 = arith.constant 0.000000e+00 : f32
    %131 = vector.broadcast %cst_53 : f32 to vector<32x1xf32>
    %132 = arith.cmpf ogt, %129, %131 : vector<32x1xf32>
    %133 = math.log %129 : vector<32x1xf32>
    %134 = arith.mulf %129, %133 : vector<32x1xf32>
    %cst_54 = arith.constant 0.000000e+00 : f32
    %135 = vector.broadcast %cst_54 : f32 to vector<32x1xf32>
    %136 = arith.select %132, %134, %135 : vector<32x1xi1>, vector<32x1xf32>
    %137 = arith.addf %122, %136 : vector<32x1xf32>
    %cst_55 = arith.constant 8.000000e+00 : f32
    %138 = vector.broadcast %cst_55 : f32 to vector<32x256xf32>
    %139 = arith.cmpf oeq, %15, %138 : vector<32x256xf32>
    %cst_56 = arith.constant 1.000000e+00 : f32
    %cst_57 = arith.constant 0.000000e+00 : f32
    %140 = vector.broadcast %cst_56 : f32 to vector<32x256xf32>
    %141 = vector.broadcast %cst_57 : f32 to vector<32x256xf32>
    %142 = arith.select %139, %140, %141 : vector<32x256xi1>, vector<32x256xf32>
    %cst_58 = arith.constant dense<0.000000e+00> : vector<32xf32>
    %143 = vector.multi_reduction <add>, %142, %cst_58 [1] : vector<32x256xf32> to vector<32xf32>
    %144 = vector.shape_cast %143 : vector<32xf32> to vector<32x1xf32>
    %145 = arith.addf %130, %144 : vector<32x1xf32>
    %cst_59 = arith.constant 0.000000e+00 : f32
    %146 = vector.broadcast %cst_59 : f32 to vector<32x1xf32>
    %147 = arith.cmpf ogt, %144, %146 : vector<32x1xf32>
    %148 = math.log %144 : vector<32x1xf32>
    %149 = arith.mulf %144, %148 : vector<32x1xf32>
    %cst_60 = arith.constant 0.000000e+00 : f32
    %150 = vector.broadcast %cst_60 : f32 to vector<32x1xf32>
    %151 = arith.select %147, %149, %150 : vector<32x1xi1>, vector<32x1xf32>
    %152 = arith.addf %137, %151 : vector<32x1xf32>
    %cst_61 = arith.constant 9.000000e+00 : f32
    %153 = vector.broadcast %cst_61 : f32 to vector<32x256xf32>
    %154 = arith.cmpf oeq, %15, %153 : vector<32x256xf32>
    %cst_62 = arith.constant 1.000000e+00 : f32
    %cst_63 = arith.constant 0.000000e+00 : f32
    %155 = vector.broadcast %cst_62 : f32 to vector<32x256xf32>
    %156 = vector.broadcast %cst_63 : f32 to vector<32x256xf32>
    %157 = arith.select %154, %155, %156 : vector<32x256xi1>, vector<32x256xf32>
    %cst_64 = arith.constant dense<0.000000e+00> : vector<32xf32>
    %158 = vector.multi_reduction <add>, %157, %cst_64 [1] : vector<32x256xf32> to vector<32xf32>
    %159 = vector.shape_cast %158 : vector<32xf32> to vector<32x1xf32>
    %160 = arith.addf %145, %159 : vector<32x1xf32>
    %cst_65 = arith.constant 0.000000e+00 : f32
    %161 = vector.broadcast %cst_65 : f32 to vector<32x1xf32>
    %162 = arith.cmpf ogt, %159, %161 : vector<32x1xf32>
    %163 = math.log %159 : vector<32x1xf32>
    %164 = arith.mulf %159, %163 : vector<32x1xf32>
    %cst_66 = arith.constant 0.000000e+00 : f32
    %165 = vector.broadcast %cst_66 : f32 to vector<32x1xf32>
    %166 = arith.select %162, %164, %165 : vector<32x1xi1>, vector<32x1xf32>
    %167 = arith.addf %152, %166 : vector<32x1xf32>
    %cst_67 = arith.constant 1.000000e+01 : f32
    %168 = vector.broadcast %cst_67 : f32 to vector<32x256xf32>
    %169 = arith.cmpf oeq, %15, %168 : vector<32x256xf32>
    %cst_68 = arith.constant 1.000000e+00 : f32
    %cst_69 = arith.constant 0.000000e+00 : f32
    %170 = vector.broadcast %cst_68 : f32 to vector<32x256xf32>
    %171 = vector.broadcast %cst_69 : f32 to vector<32x256xf32>
    %172 = arith.select %169, %170, %171 : vector<32x256xi1>, vector<32x256xf32>
    %cst_70 = arith.constant dense<0.000000e+00> : vector<32xf32>
    %173 = vector.multi_reduction <add>, %172, %cst_70 [1] : vector<32x256xf32> to vector<32xf32>
    %174 = vector.shape_cast %173 : vector<32xf32> to vector<32x1xf32>
    %175 = arith.addf %160, %174 : vector<32x1xf32>
    %cst_71 = arith.constant 0.000000e+00 : f32
    %176 = vector.broadcast %cst_71 : f32 to vector<32x1xf32>
    %177 = arith.cmpf ogt, %174, %176 : vector<32x1xf32>
    %178 = math.log %174 : vector<32x1xf32>
    %179 = arith.mulf %174, %178 : vector<32x1xf32>
    %cst_72 = arith.constant 0.000000e+00 : f32
    %180 = vector.broadcast %cst_72 : f32 to vector<32x1xf32>
    %181 = arith.select %177, %179, %180 : vector<32x1xi1>, vector<32x1xf32>
    %182 = arith.addf %167, %181 : vector<32x1xf32>
    %cst_73 = arith.constant 1.000000e+00 : f32
    %183 = vector.broadcast %cst_73 : f32 to vector<32x1xf32>
    %184 = arith.maximumf %175, %183 : vector<32x1xf32>
    %cst_74 = arith.constant 0.000000e+00 : f32
    %185 = vector.broadcast %cst_74 : f32 to vector<32x1xf32>
    %186 = arith.cmpf ogt, %175, %185 : vector<32x1xf32>
    %187 = math.log %184 : vector<32x1xf32>
    %188 = arith.divf %182, %184 : vector<32x1xf32>
    %189 = arith.subf %187, %188 : vector<32x1xf32>
    %cst_75 = arith.constant 0.000000e+00 : f32
    %190 = vector.broadcast %cst_75 : f32 to vector<32x1xf32>
    %191 = arith.select %186, %189, %190 : vector<32x1xi1>, vector<32x1xf32>
    %cst_76 = arith.constant 1.000000e-07 : f32
    %192 = vector.broadcast %cst_76 : f32 to vector<32x1xf32>
    %193 = arith.addf %11, %192 : vector<32x1xf32>
    %cst_77 = arith.constant 2.000000e+00 : f32
    %194 = vector.broadcast %cst_77 : f32 to vector<32x1xf32>
    %195 = arith.divf %194, %193 : vector<32x1xf32>
    %196 = arith.addf %191, %195 : vector<32x1xf32>
    %c0_78 = arith.constant 0 : index
    %c0_79 = arith.constant 0 : index
    %197 = vector.load %arg2[%c0_78, %c0_79] : memref<32x1xf32, #tpu.memory_space<vmem>>, vector<32x1xf32>
    tpu.vector_store %arg2[%c0_78, %c0_79], %196 {strides = array<i32>} : memref<32x1xf32, #tpu.memory_space<vmem>>, vector<32x1xf32>,
    return
  }
  func.func @transform_0(%arg0: i32) -> (i32, i32) {
    %c0_i32 = arith.constant 0 : i32
    %c0_i32_0 = arith.constant 0 : i32
    return %arg0, %c0_i32 : i32, i32
  }
  func.func @transform_1(%arg0: i32) -> (i32, i32) {
    %c0_i32 = arith.constant 0 : i32
    %c0_i32_0 = arith.constant 0 : i32
    return %arg0, %c0_i32 : i32, i32
  }
}

</mosaic_0001>

<bundles_post_ra>
// kernel: tpu_custom_call.1
= control target key start
LH: loop header
LB: loop body
LE: loop exit
PB: predicated region body
PF: predicated region fallthrough
CT: control target
= control target key end

     0   :  { %6 = vsyncpa [#allocation3], 0  ;;  %s941_s6 = smov [#allocation2]   ;;  %s1615_s0 = inlined_call_operand.hbm [shape: f32[32,256], index: 0, kind: input, shape index: {}]   ;;  %s1616_s1 = inlined_call_operand.vmem [shape: f32[32,1], index: 1, kind: output, shape index: {}]  }
   0x1   :  { %s12_s7 = sshll.u32 %s941_s6, 4  ;;  %s917_s10 = scalar_lea.hbm %s1615_s0, 1024  ;;  %s13_s7 = int_to_ptr.vmem [resolvable:$true] %s12_s7 }
   0x2   :  { %p918_p0 = scmp.ne.s32.totalorder %s1615_s0, %s917_s10  ;;  %p921_p1 = scmp.lt.u32.totalorder %s917_s10, %s1615_s0 }
   0x4   :  { %p923_p2 = pnand %p921_p1, %p918_p0 }
   0x6   :  { %926 = shalt.err (!%p923_p2)
}
   0x7   :  { %s927_s15 = scalar_lea.vmem %s13_s7, 1024  ;;  %p932_p4 = scmp.lt.s32.totalorder %s13_s7, %s13_s7 }
   0x8   :  { %p928_p3 = scmp.ne.s32.totalorder %s13_s7, %s927_s15  ;;  %p933_p5 = scmp.lt.s32.totalorder %s927_s15, %s927_s15 }
   0xa   :  { %p934_p6 = por %p933_p5, %p932_p4 }
   0xc   :  { %p935_p7 = pnand %p934_p6, %p928_p3 }
   0xe   :  { %938 = shalt.err (!%p935_p7)
}
   0xf   :  { %s942_s16 = smov 256   ;;  %s943_s17 = smov 16  }
  0x10   :  { %18 = dma.hbm_to_vmem [thread:$0]  %s1615_s0, 1024, %s13_s7, [#allocation3], %s942_s16, %s942_s16, %s943_s17  }
  0x11   :  { %939 = dma.done.wait [#allocation3], 1024  }
  0x12   :  { %940 = vsyncadd [#allocation3], 4294966272  ;;  %v967_v0 = vld [vmem:[#allocation2] sm:$0xff]  ;;  %v969_v1 = vld [vmem:[#allocation2 + $0x8] sm:$0xff]  ;;  %v944_v29 = vmov 0.0  }
  0x13   :  { %v971_v2 = vld [vmem:[#allocation2 + $0x20] sm:$0xff]  ;;  %v30_v3 = vadd.f32 %v969_v1, %v967_v0  ;;  %789 = vtanh.f32 %v967_v0  ;;  %v976_v4 = vld [vmem:[#allocation2 + $0x28] sm:$0xff]  ;;  %v981_v6 = vld [vmem:[#allocation2 + $0x10] sm:$0xff] }
  0x14   :  { %791 = vtanh.f32 %v969_v1  ;;  %v36_v5 = vadd.f32 %v976_v4, %v971_v2  ;;  %v983_v7 = vld [vmem:[#allocation2 + $0x18] sm:$0xff]  ;;  %v988_v9 = vld [vmem:[#allocation2 + $0x30] sm:$0xff] }
  0x15   :  { %31 = vadd.xlane.f32.xlu0 %v30_v3  ;;  %793 = vtanh.f32 %v971_v2  ;;  %v33_v8 = vadd.f32 %v983_v7, %v981_v6  ;;  %v990_v10 = vld [vmem:[#allocation2 + $0x38] sm:$0xff] }
  0x16   :  { %795 = vtanh.f32 %v976_v4  ;;  %37 = vadd.xlane.f32.xlu1 %v36_v5  ;;  %v39_v11 = vadd.f32 %v990_v10, %v988_v9 }
  0x17   :  { %797 = vtanh.f32 %v981_v6 }
  0x18   :  { %799 = vtanh.f32 %v983_v7 }
  0x19   :  { %34 = vadd.xlane.f32.xlu0 %v33_v8  ;;  %801 = vtanh.f32 %v988_v9 }
  0x1a   :  { %803 = vtanh.f32 %v990_v10  ;;  %40 = vadd.xlane.f32.xlu1 %v39_v11 }
  0x1d   :  { %v790_v12 = vpop.eup %789 }
  0x1e   :  { %v792_v13 = vpop.eup %791  ;;  %v87_v14 = vmul.f32 10.0, %v790_v12 }
  0x1f   :  { %v794_v15 = vpop.eup %793  ;;  %v88_v16 = vmul.f32 10.0, %v792_v13 }
  0x20   :  { %v796_v17 = vpop.eup %795  ;;  %v999_v18 = vround.rtne.f32 %v87_v14  ;;  %v91_v19 = vmul.f32 10.0, %v794_v15 }
  0x21   :  { %v798_v20 = vpop.eup %797  ;;  %v1001_v21 = vround.rtne.f32 %v88_v16  ;;  %v92_v22 = vmul.f32 10.0, %v796_v17 }
  0x22   :  { %v800_v23 = vpop.eup %799  ;;  %v1003_v24 = vround.rtne.f32 %v91_v19  ;;  %v89_v25 = vmul.f32 10.0, %v798_v20  ;;  %vm103_vm0 = vcmp.eq.f32.partialorder %v999_v18, 0.0  ;;  %vm159_vm1 = vcmp.eq.f32.partialorder %v999_v18, 1.0 }
  0x23   :  { %v802_v26 = vpop.eup %801  ;;  %v1007_v27 = vround.rtne.f32 %v92_v22  ;;  %v90_v28 = vmul.f32 10.0, %v800_v23  ;;  %vm104_vm2 = vcmp.eq.f32.partialorder %v1001_v21, 0.0  ;;  %v111_v30 = vsel %vm103_vm0, 1.0, %v944_v29 }
  0x24   :  { %v804_v31 = vpop.eup %803  ;;  %v1011_v32 = vround.rtne.f32 %v89_v25  ;;  %v93_v33 = vmul.f32 10.0, %v802_v26  ;;  %v112_v34 = vsel %vm104_vm2, 1.0, %v944_v29  ;;  %vm107_vm3 = vcmp.eq.f32.partialorder %v1003_v24, 0.0 }
  0x25   :  { %v1015_v35 = vround.rtne.f32 %v90_v28  ;;  %v94_v36 = vmul.f32 10.0, %v804_v31  ;;  %v119_v37 = vadd.f32 %v112_v34, %v111_v30  ;;  %vm108_vm4 = vcmp.eq.f32.partialorder %v1007_v27, 0.0 }
  0x26   :  { %v1018_v38 = vround.rtne.f32 %v93_v33  ;;  %vm105_vm5 = vcmp.eq.f32.partialorder %v1011_v32, 0.0  ;;  %v115_v39 = vsel %vm107_vm3, 1.0, %v944_v29  ;;  %v116_v40 = vsel %vm108_vm4, 1.0, %v944_v29 }
  0x27   :  { %v1023_v41 = vround.rtne.f32 %v94_v36  ;;  %vm106_vm6 = vcmp.eq.f32.partialorder %v1015_v35, 0.0  ;;  %v113_v42 = vsel %vm105_vm5, 1.0, %v944_v29  ;;  %120 = vadd.xlane.f32.xlu0 %v119_v37  ;;  %v125_v43 = vadd.f32 %v116_v40, %v115_v39 }
  0x28   :  { %v114_v44 = vsel %vm106_vm6, 1.0, %v944_v29  ;;  %vm109_vm7 = vcmp.eq.f32.partialorder %v1018_v38, 0.0  ;;  %vm161_vm8 = vcmp.eq.f32.partialorder %v1011_v32, 1.0  ;;  %vm162_vm9 = vcmp.eq.f32.partialorder %v1015_v35, 1.0 }
  0x29   :  { %v122_v45 = vadd.f32 %v114_v44, %v113_v42  ;;  %vm110_vm10 = vcmp.eq.f32.partialorder %v1023_v41, 0.0  ;;  %v117_v46 = vsel %vm109_vm7, 1.0, %v944_v29  ;;  %v169_v47 = vsel %vm161_vm8, 1.0, %v944_v29 }
  0x2a   :  { %v118_v48 = vsel %vm110_vm10, 1.0, %v944_v29  ;;  %v170_v49 = vsel %vm162_vm9, 1.0, %v944_v29  ;;  %vm160_vm11 = vcmp.eq.f32.partialorder %v1001_v21, 1.0  ;;  %v167_v50 = vsel %vm159_vm1, 1.0, %v944_v29 }
  0x2b   :  { %123 = vadd.xlane.f32.xlu1 %v122_v45  ;;  %v128_v51 = vadd.f32 %v118_v48, %v117_v46  ;;  %126 = vadd.xlane.f32.xlu0 %v125_v43  ;;  %v168_v52 = vsel %vm160_vm11, 1.0, %v944_v29  ;;  %vm165_vm12 = vcmp.eq.f32.partialorder %v1018_v38, 1.0  ;;  %vm166_vm13 = vcmp.eq.f32.partialorder %v1023_v41, 1.0 }
  0x2c   :  { %v175_v53 = vadd.f32 %v168_v52, %v167_v50  ;;  %vm163_vm14 = vcmp.eq.f32.partialorder %v1003_v24, 1.0  ;;  %v178_v54 = vadd.f32 %v170_v49, %v169_v47  ;;  %vm164_vm15 = vcmp.eq.f32.partialorder %v1007_v27, 1.0 }
  0x2d   :  { %v171_v55 = vsel %vm163_vm14, 1.0, %v944_v29  ;;  %v173_v56 = vsel %vm165_vm12, 1.0, %v944_v29  ;;  %v174_v57 = vsel %vm166_vm13, 1.0, %v944_v29  ;;  %v172_v58 = vsel %vm164_vm15, 1.0, %v944_v29 }
  0x2e   :  { %vm217_vm0 = vcmp.eq.f32.partialorder %v1011_v32, 2.0  ;;  %v181_v59 = vadd.f32 %v172_v58, %v171_v55  ;;  %vm218_vm1 = vcmp.eq.f32.partialorder %v1015_v35, 2.0  ;;  %vm215_vm2 = vcmp.eq.f32.partialorder %v999_v18, 2.0 }
  0x2f   :  { %129 = vadd.xlane.f32.xlu1 %v128_v51  ;;  %176 = vadd.xlane.f32.xlu0 %v175_v53  ;;  %vm216_vm3 = vcmp.eq.f32.partialorder %v1001_v21, 2.0  ;;  %v223_v60 = vsel %vm215_vm2, 1.0, %v944_v29  ;;  %v184_v62 = vadd.f32 %v174_v57, %v173_v56  ;;  %v225_v63 = vsel %vm217_vm0, 1.0, %v944_v29 }
  0x30   :  { %v224_v61 = vsel %vm216_vm3, 1.0, %v944_v29  ;;  %vm219_vm4 = vcmp.eq.f32.partialorder %v1003_v24, 2.0  ;;  %v226_v3 = vsel %vm218_vm1, 1.0, %v944_v29  ;;  %vm221_vm5 = vcmp.eq.f32.partialorder %v1018_v38, 2.0 }
  0x31   :  { %v231_v5 = vadd.f32 %v224_v61, %v223_v60  ;;  %vm220_vm6 = vcmp.eq.f32.partialorder %v1007_v27, 2.0  ;;  %vm222_vm7 = vcmp.eq.f32.partialorder %v1023_v41, 2.0  ;;  %v227_v8 = vsel %vm219_vm4, 1.0, %v944_v29 }
  0x32   :  { %v228_v11 = vsel %vm220_vm6, 1.0, %v944_v29  ;;  %vm273_vm8 = vcmp.eq.f32.partialorder %v1011_v32, 3.0  ;;  %vm274_vm9 = vcmp.eq.f32.partialorder %v1015_v35, 3.0  ;;  %vm271_vm10 = vcmp.eq.f32.partialorder %v999_v18, 3.0 }
  0x33   :  { %179 = vadd.xlane.f32.xlu1 %v178_v54  ;;  %182 = vadd.xlane.f32.xlu0 %v181_v59  ;;  %vm272_vm11 = vcmp.eq.f32.partialorder %v1001_v21, 3.0  ;;  %v234_v12 = vadd.f32 %v226_v3, %v225_v63  ;;  %v229_v13 = vsel %vm221_vm5, 1.0, %v944_v29  ;;  %v230_v14 = vsel %vm222_vm7, 1.0, %v944_v29 }
  0x34   :  { %v237_v15 = vadd.f32 %v228_v11, %v227_v8  ;;  %v281_v16 = vsel %vm273_vm8, 1.0, %v944_v29  ;;  %v282_v17 = vsel %vm274_vm9, 1.0, %v944_v29  ;;  %v279_v19 = vsel %vm271_vm10, 1.0, %v944_v29 }
  0x35   :  { %v280_v20 = vsel %vm272_vm11, 1.0, %v944_v29  ;;  %vm277_vm12 = vcmp.eq.f32.partialorder %v1018_v38, 3.0  ;;  %vm275_vm13 = vcmp.eq.f32.partialorder %v1003_v24, 3.0  ;;  %vm276_vm14 = vcmp.eq.f32.partialorder %v1007_v27, 3.0 }
  0x36   :  { %v240_v22 = vadd.f32 %v230_v14, %v229_v13  ;;  %v290_v23 = vadd.f32 %v282_v17, %v281_v16  ;;  %v287_v25 = vadd.f32 %v280_v20, %v279_v19  ;;  %vm278_vm15 = vcmp.eq.f32.partialorder %v1023_v41, 3.0 }
  0x37   :  { %185 = vadd.xlane.f32.xlu1 %v184_v62  ;;  %232 = vadd.xlane.f32.xlu0 %v231_v5  ;;  %v285_v26 = vsel %vm277_vm12, 1.0, %v944_v29  ;;  %v283_v28 = vsel %vm275_vm13, 1.0, %v944_v29  ;;  %v284_v30 = vsel %vm276_vm14, 1.0, %v944_v29  ;;  %vm329_vm0 = vcmp.eq.f32.partialorder %v1011_v32, 4.0 }
  0x38   :  { %vm330_vm1 = vcmp.eq.f32.partialorder %v1015_v35, 4.0  ;;  %vm327_vm2 = vcmp.eq.f32.partialorder %v999_v18, 4.0  ;;  %vm328_vm3 = vcmp.eq.f32.partialorder %v1001_v21, 4.0  ;;  %vm333_vm4 = vcmp.eq.f32.partialorder %v1018_v38, 4.0 }
  0x39   :  { %vm334_vm5 = vcmp.eq.f32.partialorder %v1023_v41, 4.0  ;;  %vm331_vm6 = vcmp.eq.f32.partialorder %v1003_v24, 4.0  ;;  %vm332_vm7 = vcmp.eq.f32.partialorder %v1007_v27, 4.0  ;;  %vm385_vm8 = vcmp.eq.f32.partialorder %v1011_v32, 5.0 }
  0x3a   :  { %vm386_vm9 = vcmp.eq.f32.partialorder %v1015_v35, 5.0  ;;  %v286_v31 = vsel %vm278_vm15, 1.0, %v944_v29  ;;  %v293_v33 = vadd.f32 %v284_v30, %v283_v28  ;;  %v337_v34 = vsel %vm329_vm0, 1.0, %v944_v29 }
  0x3b   :  { %235 = vadd.xlane.f32.xlu1 %v234_v12  ;;  %238 = vadd.xlane.f32.xlu0 %v237_v15  ;;  %v338_v36 = vsel %vm330_vm1, 1.0, %v944_v29  ;;  %v335_v37 = vsel %vm327_vm2, 1.0, %v944_v29  ;;  %v336_v39 = vsel %vm328_vm3, 1.0, %v944_v29  ;;  %v341_v40 = vsel %vm333_vm4, 1.0, %v944_v29 }
  0x3c   :  { %v342_v42 = vsel %vm334_vm5, 1.0, %v944_v29  ;;  %v339_v43 = vsel %vm331_vm6, 1.0, %v944_v29  ;;  %v340_v44 = vsel %vm332_vm7, 1.0, %v944_v29  ;;  %v393_v45 = vsel %vm385_vm8, 1.0, %v944_v29 }
  0x3d   :  { %v394_v46 = vsel %vm386_vm9, 1.0, %v944_v29  ;;  %v296_v47 = vadd.f32 %v286_v31, %v285_v26  ;;  %v346_v48 = vadd.f32 %v338_v36, %v337_v34  ;;  %v343_v49 = vadd.f32 %v336_v39, %v335_v37 }
  0x3e   :  { %v352_v50 = vadd.f32 %v342_v42, %v341_v40  ;;  %vm383_vm10 = vcmp.eq.f32.partialorder %v999_v18, 5.0  ;;  %vm384_vm11 = vcmp.eq.f32.partialorder %v1001_v21, 5.0  ;;  %v349_v51 = vadd.f32 %v340_v44, %v339_v43 }
  0x3f   :  { %241 = vadd.xlane.f32.xlu1 %v240_v22  ;;  %288 = vadd.xlane.f32.xlu0 %v287_v25  ;;  %v1105_v52 = vadd.f32 %v394_v46, %v393_v45  ;;  %vm389_vm12 = vcmp.eq.f32.partialorder %v1018_v38, 5.0  ;;  %vm390_vm13 = vcmp.eq.f32.partialorder %v1023_v41, 5.0  ;;  %vm387_vm14 = vcmp.eq.f32.partialorder %v1003_v24, 5.0 }
  0x40   :  { %vm388_vm15 = vcmp.eq.f32.partialorder %v1007_v27, 5.0  ;;  %vm441_vm0 = vcmp.eq.f32.partialorder %v1011_v32, 6.0  ;;  %vm442_vm1 = vcmp.eq.f32.partialorder %v1015_v35, 6.0  ;;  %v391_v53 = vsel %vm383_vm10, 1.0, %v944_v29 }
  0x41   :  { %v392_v54 = vsel %vm384_vm11, 1.0, %v944_v29  ;;  %vm439_vm2 = vcmp.eq.f32.partialorder %v999_v18, 6.0  ;;  %vm440_vm3 = vcmp.eq.f32.partialorder %v1001_v21, 6.0  ;;  %v397_v55 = vsel %vm389_vm12, 1.0, %v944_v29 }
  0x42   :  { %v398_v56 = vsel %vm390_vm13, 1.0, %v944_v29  ;;  %vm443_vm4 = vcmp.eq.f32.partialorder %v1003_v24, 6.0  ;;  %vm444_vm5 = vcmp.eq.f32.partialorder %v1007_v27, 6.0  ;;  %v395_v57 = vsel %vm387_vm14, 1.0, %v944_v29 }
  0x43   :  { %291 = vadd.xlane.f32.xlu1 %v290_v23  ;;  %294 = vadd.xlane.f32.xlu0 %v293_v33  ;;  %v396_v58 = vsel %vm388_vm15, 1.0, %v944_v29  ;;  %v449_v59 = vsel %vm441_vm0, 1.0, %v944_v29  ;;  %v450_v60 = vsel %vm442_vm1, 1.0, %v944_v29  ;;  %v447_v61 = vsel %vm439_vm2, 1.0, %v944_v29 }
  0x44   :  { %v448_v62 = vsel %vm440_vm3, 1.0, %v944_v29  ;;  %vm445_vm6 = vcmp.eq.f32.partialorder %v1018_v38, 6.0  ;;  %vm446_vm7 = vcmp.eq.f32.partialorder %v1023_v41, 6.0  ;;  %v399_v63 = vadd.f32 %v392_v54, %v391_v53 }
  0x45   :  { %v451_v3 = vsel %vm443_vm4, 1.0, %v944_v29  ;;  %v452_v5 = vsel %vm444_vm5, 1.0, %v944_v29  ;;  %vm495_vm8 = vcmp.eq.f32.partialorder %v999_v18, 7.0  ;;  %v408_v8 = vadd.f32 %v398_v56, %v397_v55 }
  0x46   :  { %v405_v11 = vadd.f32 %v396_v58, %v395_v57  ;;  %v1132_v12 = vadd.f32 %v450_v60, %v449_v59  ;;  %vm496_vm9 = vcmp.eq.f32.partialorder %v1001_v21, 7.0  ;;  %v455_v13 = vadd.f32 %v448_v62, %v447_v61 }
  0x47   :  { %297 = vadd.xlane.f32.xlu1 %v296_v47  ;;  %344 = vadd.xlane.f32.xlu0 %v343_v49  ;;  %v1136_v14 = vsel %vm445_vm6, 1.0, %v944_v29  ;;  %v1139_v15 = vsel %vm446_vm7, 1.0, %v944_v29  ;;  %vm553_vm10 = vcmp.eq.f32.partialorder %v1011_v32, 8.0  ;;  %v1142_v16 = vadd.f32 %v452_v5, %v451_v3 }
  0x48   :  { %v1145_v17 = vsel %vm495_vm8, 1.0, %v944_v29  ;;  %vm554_vm11 = vcmp.eq.f32.partialorder %v1015_v35, 8.0  ;;  %v561_v19 = vsel %vm553_vm10, 1.0, %v944_v29  ;;  %v1150_v20 = vsel %vm496_vm9, 1.0, %v944_v29 }
  0x49   :  { %v562_v22 = vsel %vm554_vm11, 1.0, %v944_v29  ;;  %vm551_vm12 = vcmp.eq.f32.partialorder %v999_v18, 8.0  ;;  %vm552_vm13 = vcmp.eq.f32.partialorder %v1001_v21, 8.0  ;;  %vm557_vm14 = vcmp.eq.f32.partialorder %v1018_v38, 8.0 }
  0x4a   :  { %v1155_v23 = vadd.f32 %v562_v22, %v561_v19  ;;  %v559_v25 = vsel %vm551_vm12, 1.0, %v944_v29  ;;  %v560_v26 = vsel %vm552_vm13, 1.0, %v944_v29  ;;  %vm558_vm15 = vcmp.eq.f32.partialorder %v1023_v41, 8.0 }
  0x4b   :  { %347 = vadd.xlane.f32.xlu1 %v346_v48  ;;  %350 = vadd.xlane.f32.xlu0 %v349_v51  ;;  %v1160_v28 = vadd.f32 %v560_v26, %v559_v25  ;;  %v565_v30 = vsel %vm557_vm14, 1.0, %v944_v29  ;;  %vm555_vm0 = vcmp.eq.f32.partialorder %v1003_v24, 8.0  ;;  %vm497_vm1 = vcmp.eq.f32.partialorder %v1011_v32, 7.0 }
  0x4c   :  { %v566_v31 = vsel %vm558_vm15, 1.0, %v944_v29  ;;  %vm556_vm2 = vcmp.eq.f32.partialorder %v1007_v27, 8.0  ;;  %v563_v33 = vsel %vm555_vm0, 1.0, %v944_v29  ;;  %vm609_vm3 = vcmp.eq.f32.partialorder %v1011_v32, 9.0 }
  0x4d   :  { %vm498_vm4 = vcmp.eq.f32.partialorder %v1015_v35, 7.0  ;;  %vm499_vm5 = vcmp.eq.f32.partialorder %v1003_v24, 7.0  ;;  %vm500_vm6 = vcmp.eq.f32.partialorder %v1007_v27, 7.0  ;;  %v1173_v34 = vadd.f32 %v566_v31, %v565_v30 }
  0x4e   :  { %v564_v36 = vsel %vm556_vm2, 1.0, %v944_v29  ;;  %vm610_vm7 = vcmp.eq.f32.partialorder %v1015_v35, 9.0  ;;  %v617_v37 = vsel %vm609_vm3, 1.0, %v944_v29  ;;  %vm607_vm8 = vcmp.eq.f32.partialorder %v999_v18, 9.0 }
  0x4f   :  { %353 = vadd.xlane.f32.xlu1 %v352_v50  ;;  %400 = vadd.xlane.f32.xlu0 %v399_v63  ;;  %v1178_v39 = vadd.f32 %v564_v36, %v563_v33  ;;  %v618_v40 = vsel %vm610_vm7, 1.0, %v944_v29  ;;  %vm608_vm9 = vcmp.eq.f32.partialorder %v1001_v21, 9.0  ;;  %v615_v43 = vsel %vm607_vm8, 1.0, %v944_v29 }
  0x50   :  { %v626_v42 = vadd.f32 %v618_v40, %v617_v37  ;;  %v616_v44 = vsel %vm608_vm9, 1.0, %v944_v29  ;;  %vm613_vm10 = vcmp.eq.f32.partialorder %v1018_v38, 9.0  ;;  %vm614_vm11 = vcmp.eq.f32.partialorder %v1023_v41, 9.0 }
  0x51   :  { %v623_v45 = vadd.f32 %v616_v44, %v615_v43  ;;  %v621_v46 = vsel %vm613_vm10, 1.0, %v944_v29  ;;  %vm611_vm12 = vcmp.eq.f32.partialorder %v1003_v24, 9.0  ;;  %v622_v47 = vsel %vm614_vm11, 1.0, %v944_v29 }
  0x52   :  { %vm612_vm13 = vcmp.eq.f32.partialorder %v1007_v27, 9.0  ;;  %v619_v48 = vsel %vm611_vm12, 1.0, %v944_v29  ;;  %vm665_vm14 = vcmp.eq.f32.partialorder %v1011_v32, 10.0  ;;  %v632_v49 = vadd.f32 %v622_v47, %v621_v46 }
  0x53   :  { %403 = vadd.xlane.f32.xlu1 %v1105_v52  ;;  %406 = vadd.xlane.f32.xlu0 %v405_v11  ;;  %v620_v50 = vsel %vm612_vm13, 1.0, %v944_v29  ;;  %vm666_vm15 = vcmp.eq.f32.partialorder %v1015_v35, 10.0  ;;  %v673_v51 = vsel %vm665_vm14, 1.0, %v944_v29  ;;  %vm663_vm0 = vcmp.eq.f32.partialorder %v999_v18, 10.0 }
  0x54   :  { %v629_v52 = vadd.f32 %v620_v50, %v619_v48  ;;  %v674_v53 = vsel %vm666_vm15, 1.0, %v944_v29  ;;  %vm664_vm2 = vcmp.eq.f32.partialorder %v1001_v21, 10.0  ;;  %v671_v55 = vsel %vm663_vm0, 1.0, %v944_v29 }
  0x55   :  { %v682_v54 = vadd.f32 %v674_v53, %v673_v51  ;;  %v672_v56 = vsel %vm664_vm2, 1.0, %v944_v29  ;;  %vm669_vm3 = vcmp.eq.f32.partialorder %v1018_v38, 10.0  ;;  %vm670_vm7 = vcmp.eq.f32.partialorder %v1023_v41, 10.0 }
  0x56   :  { %v679_v57 = vadd.f32 %v672_v56, %v671_v55  ;;  %v677_v58 = vsel %vm669_vm3, 1.0, %v944_v29  ;;  %vm667_vm8 = vcmp.eq.f32.partialorder %v1003_v24, 10.0  ;;  %v464_v59 = vadd.f32 %v1139_v15, %v1136_v14 }
  0x57   :  { %409 = vadd.xlane.f32.xlu1 %v408_v8  ;;  %456 = vadd.xlane.f32.xlu0 %v455_v13  ;;  %v678_v18 = vsel %vm670_vm7, 1.0, %v944_v29  ;;  %vm668_vm9 = vcmp.eq.f32.partialorder %v1007_v27, 10.0  ;;  %v675_v21 = vsel %vm667_vm8, 1.0, %v944_v29  ;;  %v505_v60 = vsel %vm497_vm1, 1.0, %v944_v29 }
  0x58   :  { %v511_v61 = vadd.f32 %v1150_v20, %v1145_v17  ;;  %v688_v62 = vadd.f32 %v678_v18, %v677_v58  ;;  %v676_v63 = vsel %vm668_vm9, 1.0, %v944_v29  ;;  %v506_v3 = vsel %vm498_vm4, 1.0, %v944_v29 }
  0x59   :  { %v507_v5 = vsel %vm499_vm5, 1.0, %v944_v29  ;;  %v508_v8 = vsel %vm500_vm6, 1.0, %v944_v29  ;;  %v685_v32 = vadd.f32 %v676_v63, %v675_v21  ;;  %vm501_vm1 = vcmp.eq.f32.partialorder %v1018_v38, 7.0 }
  0x5a   :  { %vm502_vm10 = vcmp.eq.f32.partialorder %v1023_v41, 7.0  ;;  %v514_v11 = vadd.f32 %v506_v3, %v505_v60  ;;  %v509_v35 = vsel %vm501_vm1, 1.0, %v944_v29 }
  0x5b   :  { %459 = vadd.xlane.f32.xlu1 %v1132_v12  ;;  %462 = vadd.xlane.f32.xlu0 %v1142_v16  ;;  %v517_v12 = vadd.f32 %v508_v8, %v507_v5  ;;  %v510_v13 = vsel %vm502_vm10, 1.0, %v944_v29 }
  0x5c   :  { %v520_v24 = vadd.f32 %v510_v13, %v509_v35 }
  0x5f   :  { %465 = vadd.xlane.f32.xlu1 %v464_v59  ;;  %512 = vadd.xlane.f32.xlu0 %v511_v61 }
  0x63   :  { %515 = vadd.xlane.f32.xlu1 %v514_v11  ;;  %518 = vadd.xlane.f32.xlu0 %v517_v12 }
  0x67   :  { %521 = vadd.xlane.f32.xlu1 %v520_v24  ;;  %568 = vadd.xlane.f32.xlu0 %v1160_v28 }
  0x6b   :  { %571 = vadd.xlane.f32.xlu1 %v1155_v23  ;;  %574 = vadd.xlane.f32.xlu0 %v1178_v39 }
  0x6f   :  { %577 = vadd.xlane.f32.xlu1 %v1173_v34  ;;  %624 = vadd.xlane.f32.xlu0 %v623_v45 }
  0x73   :  { %627 = vadd.xlane.f32.xlu1 %v626_v42  ;;  %630 = vadd.xlane.f32.xlu0 %v629_v52 }
  0x77   :  { %633 = vadd.xlane.f32.xlu1 %v632_v49  ;;  %680 = vadd.xlane.f32.xlu0 %v679_v57 }
  0x7b   :  { %683 = vadd.xlane.f32.xlu1 %v682_v54  ;;  %686 = vadd.xlane.f32.xlu0 %v685_v32 }
  0x7f   :  { %689 = vadd.xlane.f32.xlu1 %v688_v62 }
  0xa2   :  { %v32_v27 = vpop.xlane.xlu0 %31 }
  0xa3   :  { %v43_v29 = vmul.f32 0.00390625, %v32_v27  ;;  %v38_v38 = vpop.xlane.xlu1 %37 }
  0xa4   :  { %v45_v41 = vmul.f32 0.00390625, %v38_v38 }
  0xa5   :  { %v47_v14 = vsub.f32 %v967_v0, %v43_v29  ;;  %v48_v15 = vsub.f32 %v969_v1, %v43_v29 }
  0xa6   :  { %v51_v16 = vsub.f32 %v971_v2, %v45_v41  ;;  %v52_v17 = vsub.f32 %v976_v4, %v45_v41  ;;  %v35_v19 = vpop.xlane.xlu0 %34 }
  0xa7   :  { %v55_v20 = vmul.f32 %v47_v14, %v47_v14  ;;  %v56_v22 = vmul.f32 %v48_v15, %v48_v15  ;;  %v44_v23 = vmul.f32 0.00390625, %v35_v19  ;;  %v41_v25 = vpop.xlane.xlu1 %40 }
  0xa8   :  { %v59_v26 = vmul.f32 %v51_v16, %v51_v16  ;;  %v60_v28 = vmul.f32 %v52_v17, %v52_v17  ;;  %v46_v30 = vmul.f32 0.00390625, %v41_v25 }
  0xa9   :  { %v49_v31 = vsub.f32 %v981_v6, %v44_v23  ;;  %v50_v33 = vsub.f32 %v983_v7, %v44_v23  ;;  %v63_v34 = vadd.f32 %v56_v22, %v55_v20 }
  0xaa   :  { %v53_v0 = vsub.f32 %v988_v9, %v46_v30  ;;  %v54_v1 = vsub.f32 %v990_v10, %v46_v30  ;;  %v69_v4 = vadd.f32 %v60_v28, %v59_v26 }
  0xab   :  { %v57_v2 = vmul.f32 %v49_v31, %v49_v31  ;;  %v58_v36 = vmul.f32 %v50_v33, %v50_v33  ;;  %64 = vadd.xlane.f32.xlu0 %v63_v34 }
  0xac   :  { %v61_v37 = vmul.f32 %v53_v0, %v53_v0  ;;  %v62_v39 = vmul.f32 %v54_v1, %v54_v1 }
  0xad   :  { %v66_v40 = vadd.f32 %v58_v36, %v57_v2 }
  0xae   :  { %v72_v42 = vadd.f32 %v62_v39, %v61_v37 }
  0xaf   :  { %70 = vadd.xlane.f32.xlu0 %v69_v4  ;;  %67 = vadd.xlane.f32.xlu1 %v66_v40 }
  0xb3   :  { %73 = vadd.xlane.f32.xlu1 %v72_v42 }
  0xb4   :  { %v1244_v43 = vpop.xlane.xlu0 %120 }
  0xb5   :  { %805 = vlog2.f32 %v1244_v43  ;;  %vm135_vm4 = vcmp.gt.f32.partialorder %v1244_v43, 0.0 }
  0xb8   :  { %v1247_v6 = vpop.xlane.xlu1 %123  ;;  %v1249_v7 = vpop.xlane.xlu0 %126 }
  0xb9   :  { %807 = vlog2.f32 %v1247_v6  ;;  %vm136_vm5 = vcmp.gt.f32.partialorder %v1247_v6, 0.0  ;;  %vm137_vm11 = vcmp.gt.f32.partialorder %v1249_v7, 0.0 }
  0xba   :  { %809 = vlog2.f32 %v1249_v7 }
  0xbc   :  { %v1253_v9 = vpop.xlane.xlu1 %129  ;;  %v1255_v10 = vpop.xlane.xlu0 %176 }
  0xbd   :  { %811 = vlog2.f32 %v1253_v9  ;;  %vm191_vm6 = vcmp.gt.f32.partialorder %v1255_v10, 0.0  ;;  %vm138_vm14 = vcmp.gt.f32.partialorder %v1253_v9, 0.0 }
  0xbe   :  { %813 = vlog2.f32 %v1255_v10 }
  0xbf   :  { %v806_v44 = vpop.eup %805 }
  0xc0   :  { %v1259_v45 = vpop.xlane.xlu1 %179  ;;  %v1261_v46 = vpop.xlane.xlu0 %182  ;;  %v140_v48 = vmul.f32 0.6931472, %v806_v44 }
  0xc1   :  { %815 = vlog2.f32 %v1259_v45  ;;  %vm192_vm12 = vcmp.gt.f32.partialorder %v1259_v45, 0.0  ;;  %vm193_vm13 = vcmp.gt.f32.partialorder %v1261_v46, 0.0 }
  0xc2   :  { %817 = vlog2.f32 %v1261_v46  ;;  %v147_v54 = vmul.f32 %v140_v48, %v1244_v43 }
  0xc3   :  { %v808_v47 = vpop.eup %807 }
  0xc4   :  { %v810_v49 = vpop.eup %809  ;;  %v1265_v50 = vpop.xlane.xlu1 %185  ;;  %v142_v52 = vmul.f32 0.6931472, %v808_v47  ;;  %v151_v61 = vsel %vm135_vm4, %v147_v54, 0.0 }
  0xc5   :  { %v1267_v51 = vpop.xlane.xlu0 %232  ;;  %819 = vlog2.f32 %v1265_v50  ;;  %v144_v55 = vmul.f32 0.6931472, %v810_v49  ;;  %vm194_vm15 = vcmp.gt.f32.partialorder %v1265_v50, 0.0 }
  0xc6   :  { %821 = vlog2.f32 %v1267_v51  ;;  %v148_v59 = vmul.f32 %v142_v52, %v1247_v6  ;;  %vm247_vm0 = vcmp.gt.f32.partialorder %v1267_v51, 0.0 }
  0xc7   :  { %v812_v53 = vpop.eup %811  ;;  %v149_v62 = vmul.f32 %v144_v55, %v1249_v7 }
  0xc8   :  { %v814_v56 = vpop.eup %813  ;;  %v1273_v57 = vpop.xlane.xlu1 %235  ;;  %v146_v21 = vmul.f32 0.6931472, %v812_v53  ;;  %v152_v11 = vsel %vm136_vm5, %v148_v59, 0.0 }
  0xc9   :  { %v1275_v58 = vpop.xlane.xlu0 %238  ;;  %v196_v18 = vmul.f32 0.6931472, %v814_v56  ;;  %823 = vlog2.f32 %v1273_v57  ;;  %v153_v38 = vsel %vm137_vm11, %v149_v62, 0.0  ;;  %vm248_vm2 = vcmp.gt.f32.partialorder %v1273_v57, 0.0 }
  0xca   :  { %825 = vlog2.f32 %v1275_v58  ;;  %v150_v13 = vmul.f32 %v146_v21, %v1253_v9  ;;  %vm249_vm3 = vcmp.gt.f32.partialorder %v1275_v58, 0.0  ;;  %v188_v62 = vadd.f32 %v1259_v45, %v1247_v6 }
  0xcb   :  { %v816_v60 = vpop.eup %815  ;;  %v203_v63 = vmul.f32 %v196_v18, %v1255_v10 }
  0xcc   :  { %v818_v3 = vpop.eup %817  ;;  %v198_v5 = vmul.f32 0.6931472, %v816_v60  ;;  %v1286_v8 = vpop.xlane.xlu1 %241  ;;  %v154_v25 = vsel %vm138_vm14, %v150_v13, 0.0  ;;  %v187_v60 = vadd.f32 %v1255_v10, %v1244_v43  ;;  %v244_v6 = vadd.f32 %v1273_v57, %v188_v62 }
  0xcd   :  { %v1288_v32 = vpop.xlane.xlu0 %288  ;;  %v207_v12 = vsel %vm191_vm6, %v203_v63, 0.0  ;;  %v200_v35 = vmul.f32 0.6931472, %v818_v3  ;;  %827 = vlog2.f32 %v1286_v8  ;;  %vm250_vm7 = vcmp.gt.f32.partialorder %v1286_v8, 0.0 }
  0xce   :  { %v204_v24 = vmul.f32 %v198_v5, %v1259_v45  ;;  %v211_v27 = vadd.f32 %v207_v12, %v151_v61  ;;  %829 = vlog2.f32 %v1288_v32  ;;  %v189_v63 = vadd.f32 %v1261_v46, %v1249_v7 }
  0xcf   :  { %v820_v29 = vpop.eup %819  ;;  %v205_v41 = vmul.f32 %v200_v35, %v1261_v46  ;;  %v243_v10 = vadd.f32 %v1267_v51, %v187_v60  ;;  %vm303_vm9 = vcmp.gt.f32.partialorder %v1288_v32, 0.0 }
  0xd0   :  { %v822_v14 = vpop.eup %821  ;;  %v208_v15 = vsel %vm192_vm12, %v204_v24, 0.0  ;;  %v202_v16 = vmul.f32 0.6931472, %v820_v29  ;;  %v1298_v17 = vpop.xlane.xlu1 %291  ;;  %v245_v7 = vadd.f32 %v1275_v58, %v189_v63 }
  0xd1   :  { %v1300_v19 = vpop.xlane.xlu0 %294  ;;  %v212_v20 = vadd.f32 %v208_v15, %v152_v11  ;;  %v209_v22 = vsel %vm193_vm13, %v205_v41, 0.0  ;;  %v252_v23 = vmul.f32 0.6931472, %v822_v14  ;;  %831 = vlog2.f32 %v1298_v17 }
  0xd2   :  { %v206_v26 = vmul.f32 %v202_v16, %v1265_v50  ;;  %v213_v28 = vadd.f32 %v209_v22, %v153_v38  ;;  %833 = vlog2.f32 %v1300_v19  ;;  %v190_v11 = vadd.f32 %v1265_v50, %v1253_v9 }
  0xd3   :  { %v259_v30 = vmul.f32 %v252_v23, %v1267_v51  ;;  %v824_v31 = vpop.eup %823  ;;  %v299_v51 = vadd.f32 %v1288_v32, %v243_v10  ;;  %vm304_vm8 = vcmp.gt.f32.partialorder %v1298_v17, 0.0  ;;  %vm305_vm1 = vcmp.gt.f32.partialorder %v1300_v19, 0.0 }
  0xd4   :  { %v210_v33 = vsel %vm194_vm15, %v206_v26, 0.0  ;;  %v1308_v34 = vpop.xlane.xlu1 %297  ;;  %v826_v1 = vpop.eup %825  ;;  %v254_v36 = vmul.f32 0.6931472, %v824_v31  ;;  %v246_v13 = vadd.f32 %v1286_v8, %v190_v11 }
  0xd5   :  { %v1310_v0 = vpop.xlane.xlu0 %344  ;;  %v214_v2 = vadd.f32 %v210_v33, %v154_v25  ;;  %v263_v4 = vsel %vm247_vm0, %v259_v30, 0.0  ;;  %v256_v39 = vmul.f32 0.6931472, %v826_v1  ;;  %835 = vlog2.f32 %v1308_v34 }
  0xd6   :  { %v1313_v37 = vadd.f32 %v263_v4, %v211_v27  ;;  %v260_v40 = vmul.f32 %v254_v36, %v1273_v57  ;;  %837 = vlog2.f32 %v1310_v0  ;;  %v300_v57 = vadd.f32 %v1298_v17, %v244_v6 }
  0xd7   :  { %v828_v42 = vpop.eup %827  ;;  %v261_v44 = vmul.f32 %v256_v39, %v1275_v58  ;;  %v301_v58 = vadd.f32 %v1300_v19, %v245_v7  ;;  %v302_v15 = vadd.f32 %v1308_v34, %v246_v13  ;;  %vm306_vm10 = vcmp.gt.f32.partialorder %v1308_v34, 0.0 }
  0xd8   :  { %v1319_v47 = vpop.xlane.xlu1 %347  ;;  %v264_v49 = vsel %vm248_vm2, %v260_v40, 0.0  ;;  %v258_v52 = vmul.f32 0.6931472, %v828_v42  ;;  %v830_v43 = vpop.eup %829  ;;  %v355_v22 = vadd.f32 %v1310_v0, %v299_v51  ;;  %vm359_vm4 = vcmp.gt.f32.partialorder %v1310_v0, 0.0 }
  0xd9   :  { %v1321_v48 = vpop.xlane.xlu0 %350  ;;  %v1324_v53 = vadd.f32 %v264_v49, %v212_v20  ;;  %v265_v54 = vsel %vm249_vm3, %v261_v44, 0.0  ;;  %839 = vlog2.f32 %v1319_v47  ;;  %v308_v9 = vmul.f32 0.6931472, %v830_v43 }
  0xda   :  { %v262_v55 = vmul.f32 %v258_v52, %v1286_v8  ;;  %v1329_v56 = vadd.f32 %v265_v54, %v213_v28  ;;  %841 = vlog2.f32 %v1321_v48  ;;  %v356_v28 = vadd.f32 %v1319_v47, %v300_v57 }
  0xdb   :  { %v832_v12 = vpop.eup %831  ;;  %v315_v14 = vmul.f32 %v308_v9, %v1288_v32  ;;  %vm360_vm5 = vcmp.gt.f32.partialorder %v1319_v47, 0.0  ;;  %v357_v36 = vadd.f32 %v1321_v48, %v301_v58  ;;  %vm361_vm6 = vcmp.gt.f32.partialorder %v1321_v48, 0.0 }
  0xdc   :  { %v1331_v59 = vpop.xlane.xlu1 %353  ;;  %v266_v21 = vsel %vm250_vm7, %v262_v55, 0.0  ;;  %v834_v35 = vpop.eup %833  ;;  %v310_v50 = vmul.f32 0.6931472, %v832_v12 }
  0xdd   :  { %v1333_v18 = vpop.xlane.xlu0 %400  ;;  %v1338_v61 = vadd.f32 %v266_v21, %v214_v2  ;;  %843 = vlog2.f32 %v1331_v59  ;;  %v312_v27 = vmul.f32 0.6931472, %v834_v35  ;;  %v319_v2 = vsel %vm303_vm9, %v315_v14, 0.0 }
  0xde   :  { %845 = vlog2.f32 %v1333_v18  ;;  %v316_v16 = vmul.f32 %v310_v50, %v1298_v17  ;;  %v358_v40 = vadd.f32 %v1331_v59, %v302_v15  ;;  %vm362_vm11 = vcmp.gt.f32.partialorder %v1331_v59, 0.0 }
  0xdf   :  { %v836_v24 = vpop.eup %835  ;;  %v317_v23 = vmul.f32 %v312_v27, %v1300_v19  ;;  %v323_v52 = vadd.f32 %v319_v2, %v1313_v37  ;;  %v411_v55 = vadd.f32 %v1333_v18, %v355_v22  ;;  %vm415_vm13 = vcmp.gt.f32.partialorder %v1333_v18, 0.0 }
  0xe0   :  { %v1346_v3 = vpop.xlane.xlu1 %403  ;;  %v838_v29 = vpop.eup %837  ;;  %v314_v20 = vmul.f32 0.6931472, %v836_v24  ;;  %v320_v4 = vsel %vm304_vm8, %v316_v16, 0.0 }
  0xe1   :  { %v1348_v5 = vpop.xlane.xlu0 %406  ;;  %847 = vlog2.f32 %v1346_v3  ;;  %v364_v25 = vmul.f32 0.6931472, %v838_v29  ;;  %v321_v42 = vsel %vm305_vm1, %v317_v23, 0.0  ;;  %v412_v19 = vadd.f32 %v1346_v3, %v356_v28 }
  0xe2   :  { %849 = vlog2.f32 %v1348_v5  ;;  %v318_v39 = vmul.f32 %v314_v20, %v1308_v34  ;;  %vm416_vm12 = vcmp.gt.f32.partialorder %v1346_v3, 0.0  ;;  %v324_v37 = vadd.f32 %v320_v4, %v1324_v53 }
  0xe3   :  { %v840_v41 = vpop.eup %839  ;;  %v371_v32 = vmul.f32 %v364_v25, %v1310_v0  ;;  %v325_v11 = vadd.f32 %v321_v42, %v1329_v56  ;;  %v413_v7 = vadd.f32 %v1348_v5, %v357_v36  ;;  %vm417_vm15 = vcmp.gt.f32.partialorder %v1348_v5, 0.0 }
  0xe4   :  { %v1357_v45 = vpop.xlane.xlu1 %409  ;;  %v842_v26 = vpop.eup %841  ;;  %v366_v30 = vmul.f32 0.6931472, %v840_v41  ;;  %v322_v63 = vsel %vm306_vm10, %v318_v39, 0.0 }
  0xe5   :  { %v1359_v46 = vpop.xlane.xlu0 %456  ;;  %851 = vlog2.f32 %v1357_v45  ;;  %v368_v44 = vmul.f32 0.6931472, %v842_v26  ;;  %v375_v10 = vsel %vm359_vm4, %v371_v32, 0.0  ;;  %v326_v0 = vadd.f32 %v322_v63, %v1338_v61 }
  0xe6   :  { %853 = vlog2.f32 %v1359_v46  ;;  %v372_v17 = vmul.f32 %v366_v30, %v1319_v47  ;;  %v414_v50 = vadd.f32 %v1357_v45, %v358_v40  ;;  %vm418_vm14 = vcmp.gt.f32.partialorder %v1357_v45, 0.0 }
  0xe7   :  { %v844_v1 = vpop.eup %843  ;;  %v373_v12 = vmul.f32 %v368_v44, %v1321_v48  ;;  %v379_v51 = vadd.f32 %v375_v10, %v323_v52  ;;  %v467_v27 = vadd.f32 %v1359_v46, %v411_v55  ;;  %vm471_vm0 = vcmp.gt.f32.partialorder %v1359_v46, 0.0 }
  0xe8   :  { %v1369_v8 = vpop.xlane.xlu1 %459  ;;  %v846_v49 = vpop.eup %845  ;;  %v370_v54 = vmul.f32 0.6931472, %v844_v1  ;;  %v376_v6 = vsel %vm360_vm5, %v372_v17, 0.0 }
  0xe9   :  { %v1371_v38 = vpop.xlane.xlu0 %462  ;;  %855 = vlog2.f32 %v1369_v8  ;;  %v420_v35 = vmul.f32 0.6931472, %v846_v49  ;;  %v380_v57 = vadd.f32 %v376_v6, %v324_v37  ;;  %v377_v58 = vsel %vm361_vm6, %v373_v12, 0.0 }
  0xea   :  { %857 = vlog2.f32 %v1371_v38  ;;  %v374_v53 = vmul.f32 %v370_v54, %v1331_v59  ;;  %v468_v41 = vadd.f32 %v1369_v8, %v412_v19  ;;  %vm472_vm2 = vcmp.gt.f32.partialorder %v1369_v8, 0.0 }
  0xeb   :  { %v848_v62 = vpop.eup %847  ;;  %v427_v61 = vmul.f32 %v420_v35, %v1333_v18  ;;  %v469_v48 = vadd.f32 %v1371_v38, %v413_v7  ;;  %vm473_vm3 = vcmp.gt.f32.partialorder %v1371_v38, 0.0  ;;  %v381_v26 = vadd.f32 %v377_v58, %v325_v11 }
  0xec   :  { %v1386_v31 = vpop.xlane.xlu1 %465  ;;  %v850_v43 = vpop.eup %849  ;;  %v422_v34 = vmul.f32 0.6931472, %v848_v62  ;;  %v378_v14 = vsel %vm362_vm11, %v374_v53, 0.0 }
  0xed   :  { %v1388_v33 = vpop.xlane.xlu0 %512  ;;  %859 = vlog2.f32 %v1386_v31  ;;  %v424_v24 = vmul.f32 0.6931472, %v850_v43  ;;  %v382_v1 = vadd.f32 %v378_v14, %v326_v0  ;;  %v431_v2 = vsel %vm415_vm13, %v427_v61, 0.0 }
  0xee   :  { %861 = vlog2.f32 %v1388_v33  ;;  %v428_v15 = vmul.f32 %v422_v34, %v1346_v3  ;;  %v470_v36 = vadd.f32 %v1386_v31, %v414_v50  ;;  %vm474_vm7 = vcmp.gt.f32.partialorder %v1386_v31, 0.0 }
  0xef   :  { %v852_v9 = vpop.eup %851  ;;  %v429_v59 = vmul.f32 %v424_v24, %v1348_v5  ;;  %v523_v52 = vadd.f32 %v1388_v33, %v467_v27  ;;  %vm527_vm8 = vcmp.gt.f32.partialorder %v1388_v33, 0.0  ;;  %v435_v3 = vadd.f32 %v431_v2, %v379_v51 }
  0xf0   :  { %v1407_v21 = vpop.xlane.xlu1 %515  ;;  %v854_v47 = vpop.eup %853  ;;  %v426_v16 = vmul.f32 0.6931472, %v852_v9  ;;  %v432_v39 = vsel %vm416_vm12, %v428_v15, 0.0 }
  0xf1   :  { %v1409_v60 = vpop.xlane.xlu0 %518  ;;  %863 = vlog2.f32 %v1407_v21  ;;  %v476_v25 = vmul.f32 0.6931472, %v854_v47  ;;  %v433_v17 = vsel %vm417_vm15, %v429_v59, 0.0  ;;  %v436_v62 = vadd.f32 %v432_v39, %v380_v57 }
  0xf2   :  { %865 = vlog2.f32 %v1409_v60  ;;  %v430_v40 = vmul.f32 %v426_v16, %v1357_v45  ;;  %v524_v19 = vadd.f32 %v1407_v21, %v468_v41  ;;  %vm528_vm9 = vcmp.gt.f32.partialorder %v1407_v21, 0.0 }
  0xf3   :  { %v856_v29 = vpop.eup %855  ;;  %v483_v18 = vmul.f32 %v476_v25, %v1359_v46  ;;  %v437_v12 = vadd.f32 %v433_v17, %v381_v26  ;;  %v525_v6 = vadd.f32 %v1409_v60, %v469_v48  ;;  %vm529_vm10 = vcmp.gt.f32.partialorder %v1409_v60, 0.0 }
  0xf4   :  { %v1428_v56 = vpop.xlane.xlu1 %521  ;;  %v858_v23 = vpop.eup %857  ;;  %v478_v28 = vmul.f32 0.6931472, %v856_v29  ;;  %v434_v63 = vsel %vm418_vm14, %v430_v40, 0.0 }
  0xf5   :  { %v1430_v13 = vpop.xlane.xlu0 %568  ;;  %867 = vlog2.f32 %v1428_v56  ;;  %v480_v42 = vmul.f32 0.6931472, %v858_v23  ;;  %v487_v35 = vsel %vm471_vm0, %v483_v18, 0.0  ;;  %v438_v9 = vadd.f32 %v434_v63, %v382_v1 }
  0xf6   :  { %869 = vlog2.f32 %v1430_v13  ;;  %v484_v54 = vmul.f32 %v478_v28, %v1369_v8  ;;  %v579_v34 = vadd.f32 %v1430_v13, %v523_v52  ;;  %v526_v46 = vadd.f32 %v1428_v56, %v470_v36 }
  0xf7   :  { %v860_v30 = vpop.eup %859  ;;  %v485_v11 = vmul.f32 %v480_v42, %v1371_v38  ;;  %v491_v47 = vadd.f32 %v487_v35, %v435_v3  ;;  %vm530_vm1 = vcmp.gt.f32.partialorder %v1428_v56, 0.0  ;;  %vm583_vm4 = vcmp.gt.f32.partialorder %v1430_v13, 0.0 }
  0xf8   :  { %v1446_v20 = vpop.xlane.xlu1 %571  ;;  %v862_v4 = vpop.eup %861  ;;  %v482_v55 = vmul.f32 0.6931472, %v860_v30  ;;  %v488_v45 = vsel %vm472_vm2, %v484_v54, 0.0 }
  0xf9   :  { %v1448_v22 = vpop.xlane.xlu0 %574  ;;  %871 = vlog2.f32 %v1446_v20  ;;  %v532_v37 = vmul.f32 0.6931472, %v862_v4  ;;  %v489_v8 = vsel %vm473_vm3, %v485_v11, 0.0  ;;  %v492_v58 = vadd.f32 %v488_v45, %v436_v62 }
  0xfa   :  { %v486_v53 = vmul.f32 %v482_v55, %v1386_v31  ;;  %v580_v61 = vadd.f32 %v1446_v20, %v524_v19  ;;  %v581_v38 = vadd.f32 %v1448_v22, %v525_v6  ;;  %vm584_vm5 = vcmp.gt.f32.partialorder %v1446_v20, 0.0 }
  0xfb   :  { %v864_v49 = vpop.eup %863  ;;  %v539_v0 = vmul.f32 %v532_v37, %v1388_v33  ;;  %v1517_v23 = vadd.f32 %v489_v8, %v437_v12  ;;  %vm585_vm13 = vcmp.gt.f32.partialorder %v1448_v22, 0.0 }
  0xfc   :  { %v1463_v32 = vpop.xlane.xlu1 %577  ;;  %v534_v43 = vmul.f32 0.6931472, %v864_v49  ;;  %v866_v7 = vpop.eup %865  ;;  %v490_v14 = vsel %vm474_vm7, %v486_v53, 0.0 }
  0xfd   :  { %v1465_v44 = vpop.xlane.xlu0 %624  ;;  %v536_v15 = vmul.f32 0.6931472, %v866_v7  ;;  %v543_v25 = vsel %vm527_vm8, %v539_v0, 0.0  ;;  %v494_v1 = vadd.f32 %v490_v14, %v438_v9  ;;  %v582_v36 = vadd.f32 %v1463_v32, %v526_v46 }
  0xfe   :  { %873 = vlog2.f32 %v1465_v44  ;;  %v540_v51 = vmul.f32 %v534_v43, %v1407_v21  ;;  %v635_v24 = vadd.f32 %v1465_v44, %v579_v34  ;;  %v547_v39 = vadd.f32 %v543_v25, %v491_v47 }
  0xff   :  { %875 = vlog2.f32 %v1463_v32  ;;  %v868_v50 = vpop.eup %867  ;;  %v541_v40 = vmul.f32 %v536_v15, %v1409_v60  ;;  %vm639_vm6 = vcmp.gt.f32.partialorder %v1465_v44, 0.0  ;;  %vm586_vm11 = vcmp.gt.f32.partialorder %v1463_v32, 0.0 }
 0x100   :  { %v1479_v10 = vpop.xlane.xlu1 %627  ;;  %v870_v57 = vpop.eup %869  ;;  %v538_v48 = vmul.f32 0.6931472, %v868_v50  ;;  %v544_v31 = vsel %vm528_vm9, %v540_v51, 0.0 }
 0x101   :  { %v1482_v5 = vpop.xlane.xlu0 %630  ;;  %877 = vlog2.f32 %v1479_v10  ;;  %v636_v26 = vadd.f32 %v1479_v10, %v580_v61  ;;  %v588_v59 = vmul.f32 0.6931472, %v870_v57  ;;  %v548_v42 = vadd.f32 %v544_v31, %v492_v58 }
 0x102   :  { %879 = vlog2.f32 %v1448_v22  ;;  %v542_v49 = vmul.f32 %v538_v48, %v1428_v56  ;;  %v637_v62 = vadd.f32 %v1482_v5, %v581_v38  ;;  %vm640_vm12 = vcmp.gt.f32.partialorder %v1479_v10, 0.0 }
 0x103   :  { %881 = vlog2.f32 %v1482_v5  ;;  %v872_v41 = vpop.eup %871  ;;  %v595_v54 = vmul.f32 %v588_v59, %v1430_v13  ;;  %v545_v53 = vsel %vm529_vm10, %v541_v40, 0.0  ;;  %vm641_vm14 = vcmp.gt.f32.partialorder %v1482_v5, 0.0 }
 0x104   :  { %v1502_v27 = vpop.xlane.xlu1 %633  ;;  %v590_v2 = vmul.f32 0.6931472, %v872_v41  ;;  %v546_v45 = vsel %vm530_vm1, %v542_v49, 0.0 }
 0x105   :  { %v1504_v29 = vpop.xlane.xlu0 %680  ;;  %883 = vlog2.f32 %v1502_v27  ;;  %v638_v55 = vadd.f32 %v1502_v27, %v582_v36  ;;  %v599_v9 = vsel %vm583_vm4, %v595_v54, 0.0  ;;  %v550_v47 = vadd.f32 %v546_v45, %v494_v1 }
 0x106   :  { %v1515_v16 = vadd.f32 %v1504_v29, %v635_v24  ;;  %885 = vlog2.f32 %v1504_v29  ;;  %v596_v63 = vmul.f32 %v590_v2, %v1446_v20  ;;  %vm695_vm15 = vcmp.gt.f32.partialorder %v1504_v29, 0.0 }
 0x107   :  { %v603_v38 = vadd.f32 %v599_v9, %v547_v39  ;;  %vm642_vm2 = vcmp.gt.f32.partialorder %v1502_v27, 0.0  ;;  %v549_v39 = vadd.f32 %v545_v53, %v1517_v23  ;;  %vm767_vm4 = vcmask 7168  }
 0x108   :  { %v1524_v28 = vpop.xlane.xlu1 %683  ;;  %v719_v30 = vmax.f32 %v1515_v16, 1.0  ;;  %v874_v4 = vpop.eup %873  ;;  %v600_v46 = vsel %vm584_vm5, %v596_v63, 0.0  ;;  %vm723_vm7 = vcmp.gt.f32.partialorder %v1515_v16, 0.0 }
 0x109   :  { %v1530_v33 = vadd.f32 %v1524_v28, %v636_v26  ;;  %887 = vlog2.f32 %v1524_v28  ;;  %v876_v21 = vpop.eup %875  ;;  %v644_v18 = vmul.f32 0.6931472, %v874_v4  ;;  %v1538_v3 = vpop.xlane.xlu0 %686  ;;  %v604_v61 = vadd.f32 %v600_v46, %v548_v42 }
 0x10a   :  { %889 = vlog2.f32 %v719_v30  ;;  %v594_v43 = vmul.f32 0.6931472, %v876_v21  ;;  %v1552_v35 = vadd.f32 %v1538_v3, %v637_v62  ;;  %vm696_vm0 = vcmp.gt.f32.partialorder %v1524_v28, 0.0 }
 0x10b   :  { %v720_v52 = vmax.f32 %v1530_v33, 1.0  ;;  %v878_v17 = vpop.eup %877  ;;  %v651_v34 = vmul.f32 %v644_v18, %v1465_v44  ;;  %vm697_vm8 = vcmp.gt.f32.partialorder %v1538_v3, 0.0  ;;  %vm724_vm9 = vcmp.gt.f32.partialorder %v1530_v33, 0.0 }
 0x10c   :  { %v1543_v19 = vpop.xlane.xlu1 %689  ;;  %v880_v37 = vpop.eup %879  ;;  %v646_v11 = vmul.f32 0.6931472, %v878_v17  ;;  %v598_v8 = vmul.f32 %v594_v43, %v1463_v32  ;;  %v721_v51 = vmax.f32 %v1552_v35, 1.0  ;;  %vm725_vm10 = vcmp.gt.f32.partialorder %v1552_v35, 0.0 }
 0x10d   :  { %891 = vlog2.f32 %v720_v52  ;;  %v1549_v12 = vadd.f32 %v1543_v19, %v638_v55  ;;  %v882_v6 = vpop.eup %881  ;;  %v592_v0 = vmul.f32 0.6931472, %v880_v37  ;;  %v655_v24 = vsel %vm639_vm6, %v651_v34, 0.0 }
 0x10e   :  { %893 = vrcp.f32 %v720_v52  ;;  %v652_v56 = vmul.f32 %v646_v11, %v1479_v10  ;;  %v648_v13 = vmul.f32 0.6931472, %v882_v6  ;;  %v602_v48 = vsel %vm586_vm11, %v598_v8, 0.0 }
 0x10f   :  { %895 = vrcp.f32 %v719_v30  ;;  %v884_v7 = vpop.eup %883  ;;  %v722_v60 = vmax.f32 %v1549_v12, 1.0  ;;  %v597_v41 = vmul.f32 %v592_v0, %v1448_v22  ;;  %v659_v26 = vadd.f32 %v655_v24, %v603_v38 }
 0x110   :  { %897 = vlog2.f32 %v1543_v19  ;;  %v886_v50 = vpop.eup %885  ;;  %v650_v57 = vmul.f32 0.6931472, %v884_v7  ;;  %v656_v14 = vsel %vm640_vm12, %v652_v56, 0.0  ;;  %v653_v31 = vmul.f32 %v648_v13, %v1482_v5 }
 0x111   :  { %899 = vlog2.f32 %v1538_v3  ;;  %v700_v20 = vmul.f32 0.6931472, %v886_v50  ;;  %v660_v36 = vadd.f32 %v656_v14, %v604_v61  ;;  %v601_v40 = vsel %vm585_vm13, %v597_v41, 0.0 }
 0x112   :  { %901 = vlog2.f32 %v722_v60  ;;  %v654_v30 = vmul.f32 %v650_v57, %v1502_v27  ;;  %v606_v49 = vadd.f32 %v602_v48, %v550_v47  ;;  %v657_v27 = vsel %vm641_vm14, %v653_v31, 0.0 }
 0x113   :  { %v888_v58 = vpop.eup %887  ;;  %v707_v25 = vmul.f32 %v700_v20, %v1504_v29  ;;  %903 = vlog2.f32 %v721_v51  ;;  %vm698_vm3 = vcmp.gt.f32.partialorder %v1543_v19, 0.0  ;;  %v605_v63 = vadd.f32 %v601_v40, %v549_v39 }
 0x114   :  { %v702_v15 = vmul.f32 0.6931472, %v888_v58  ;;  %v890_v44 = vpop.eup %889  ;;  %905 = vrcp.f32 %v722_v60  ;;  %v658_v54 = vsel %vm642_vm2, %v654_v30, 0.0  ;;  %vm726_vm1 = vcmp.gt.f32.partialorder %v1549_v12, 0.0 }
 0x115   :  { %v711_v10 = vsel %vm695_vm15, %v707_v25, 0.0  ;;  %907 = vrcp.f32 %v721_v51  ;;  %v728_v52 = vmul.f32 0.6931472, %v890_v44  ;;  %v662_v11 = vadd.f32 %v658_v54, %v606_v49 }
 0x116   :  { %v708_v1 = vmul.f32 %v702_v15, %v1524_v28  ;;  %v715_v4 = vadd.f32 %v711_v10, %v659_v26  ;;  %v661_v53 = vadd.f32 %v657_v27, %v605_v63 }
 0x117   :  { %v892_v59 = vpop.eup %891 }
 0x118   :  { %v894_v2 = vpop.eup %893  ;;  %v712_v21 = vsel %vm696_vm0, %v708_v1, 0.0  ;;  %v730_v37 = vmul.f32 0.6931472, %v892_v59 }
 0x119   :  { %v896_v32 = vpop.eup %895  ;;  %v716_v29 = vadd.f32 %v712_v21, %v660_v36 }
 0x11a   :  { %v898_v42 = vpop.eup %897  ;;  %v736_v18 = vmul.f32 %v896_v32, %v715_v4 }
 0x11b   :  { %v900_v17 = vpop.eup %899  ;;  %v706_v55 = vmul.f32 0.6931472, %v898_v42  ;;  %v738_v23 = vmul.f32 %v894_v2, %v716_v29 }
 0x11c   :  { %v704_v62 = vmul.f32 0.6931472, %v900_v17  ;;  %v743_v22 = vsub.f32 %v728_v52, %v736_v18  ;;  %v902_v45 = vpop.eup %901 }
 0x11d   :  { %v710_v28 = vmul.f32 %v706_v55, %v1543_v19  ;;  %v744_v5 = vsub.f32 %v730_v37, %v738_v23  ;;  %v904_v7 = vpop.eup %903  ;;  %v734_v47 = vmul.f32 0.6931472, %v902_v45 }
 0x11e   :  { %v709_v43 = vmul.f32 %v704_v62, %v1538_v3  ;;  %v747_v6 = vsel %vm723_vm7, %v743_v22, 0.0  ;;  %v906_v46 = vpop.eup %905  ;;  %v732_v3 = vmul.f32 0.6931472, %v904_v7 }
 0x11f   :  { %v714_v34 = vsel %vm698_vm3, %v710_v28, 0.0  ;;  %v748_v16 = vsel %vm724_vm9, %v744_v5, 0.0  ;;  %v908_v60 = vpop.eup %907 }
 0x120   :  { %v718_v9 = vadd.f32 %v714_v34, %v662_v11  ;;  %v713_v0 = vsel %vm697_vm8, %v709_v43, 0.0 }
 0x121   :  { %v717_v56 = vadd.f32 %v713_v0, %v661_v53 }
 0x122   :  { %v742_v50 = vmul.f32 %v906_v46, %v718_v9 }
 0x123   :  { %v740_v8 = vmul.f32 %v908_v60, %v717_v56 }
 0x124   :  { %v746_v13 = vsub.f32 %v734_v47, %v742_v50 }
 0x125   :  { %v745_v51 = vsub.f32 %v732_v3, %v740_v8 }
 0x126   :  { %v750_v33 = vsel %vm726_vm1, %v746_v13, 0.0 }
 0x127   :  { %v749_v19 = vsel %vm725_vm10, %v745_v51, 0.0 }
 0x138   :  { %v65_v24 = vpop.xlane.xlu0 %64 }
 0x139   :  { %v75_v57 = vmul.f32 0.003921569, %v65_v24 }
 0x13b   :  { %v751_v20 = vadd.f32 1e-07, %v75_v57 }
 0x13c   :  { %v68_v58 = vpop.xlane.xlu1 %67  ;;  %v71_v61 = vpop.xlane.xlu0 %70 }
 0x13d   :  { %909 = vrcp.f32 %v751_v20  ;;  %v76_v38 = vmul.f32 0.003921569, %v68_v58  ;;  %v77_v41 = vmul.f32 0.003921569, %v71_v61 }
 0x13f   :  { %v752_v14 = vadd.f32 1e-07, %v76_v38  ;;  %v753_v15 = vadd.f32 1e-07, %v77_v41 }
 0x140   :  { %v74_v25 = vpop.xlane.xlu1 %73 }
 0x141   :  { %911 = vrcp.f32 %v752_v14  ;;  %v78_v44 = vmul.f32 0.003921569, %v74_v25 }
 0x142   :  { %913 = vrcp.f32 %v753_v15 }
 0x143   :  { %v754_v48 = vadd.f32 1e-07, %v78_v44 }
 0x145   :  { %915 = vrcp.f32 %v754_v48 }
 0x147   :  { %v910_v12 = vpop.eup %909 }
 0x148   :  { %v756_v35 = vmul.f32 2.0, %v910_v12 }
 0x14a   :  { %v763_v26 = vadd.f32 %v756_v35, %v747_v6 }
 0x14b   :  { %v912_v31 = vpop.eup %911 }
 0x14c   :  { %v914_v59 = vpop.eup %913  ;;  %768 = vst.msk [vmem:[%s1616_s1] sm:$0xff] %vm767_vm4, %v763_v26  ;;  %v758_v30 = vmul.f32 2.0, %v912_v31 }
 0x14d   :  { %v760_v1 = vmul.f32 2.0, %v914_v59 }
 0x14e   :  { %v764_v10 = vadd.f32 %v758_v30, %v748_v16 }
 0x14f   :  { %v916_v2 = vpop.eup %915  ;;  %v765_v36 = vadd.f32 %v760_v1, %v749_v19 }
 0x150   :  { %769 = vst.msk [vmem:[%s1616_s1 + $0x8] sm:$0xff] %vm767_vm4, %v764_v10  ;;  %v762_v4 = vmul.f32 2.0, %v916_v2 }
 0x151   :  { %770 = vst.msk [vmem:[%s1616_s1 + $0x10] sm:$0xff] %vm767_vm4, %v765_v36 }
 0x152   :  { %v766_v32 = vadd.f32 %v762_v4, %v750_v33 }
 0x154   :  { %771 = vst.msk [vmem:[%s1616_s1 + $0x18] sm:$0xff] %vm767_vm4, %v766_v32 }
 0x155   :  { %776 = vsyncpa [#allocation3], 1 }

</bundles_post_ra>
